<compile_context>
chip_gen: v7x
topology: tpu7x:2x2x1
jax: 0.10.0
libtpu: 0.0.40
codegen_flags: <defaults>
</compile_context>

<pallas_src>
import math
from functools import partial

import jax
import jax.numpy as jnp
from jax.experimental import pallas as pl
from jax.experimental.pallas import tpu as pltpu


def _gelu_tanh(x):
    # TODO(synk): torch.nn.GELU default is the exact erf form; tanh approximation used
    # here (tanh lowers to the EUP slot; erf has no guaranteed Mosaic lowering).
    c = math.sqrt(2.0 / math.pi)
    return 0.5 * x * (1.0 + jnp.tanh(c * (x + 0.044715 * x * x * x)))


def _layernorm(x, gamma, beta, eps):
    mu = jnp.mean(x, axis=-1, keepdims=True)
    var = jnp.mean((x - mu) ** 2, axis=-1, keepdims=True)
    return (x - mu) * jax.lax.rsqrt(var + eps) * gamma + beta


def self_attention_layer_kernel(
    xq_ref, xkv_ref,
    wq_ref, bq_ref, wkv_ref, bkv_ref, wo_ref, bo_ref,
    g1_ref, be1_ref, w1_ref, bf1_ref, w2_ref, bf2_ref, g2_ref, be2_ref,
    o_ref,
    kv_scratch,
    *, d_model, num_heads, norm_eps, is_gelu,
):
    D = d_model
    hd = D // num_heads

    # ---- K/V projection for the full sequence: computed once per batch element.
    # The query-tile grid axis is "arbitrary" (sequential), so the bf16 scratch written
    # at q == 0 is reused by every subsequent query tile of this batch element. ----
    @pl.when(pl.program_id(1) == 0)
    def _():
        xkv = xkv_ref[...].astype(jnp.bfloat16)                          # (S, D)
        kv = jnp.dot(xkv, wkv_ref[...],
                     preferred_element_type=jnp.float32) + bkv_ref[...]  # (S, 2D) f32
        kv_scratch[...] = kv.astype(jnp.bfloat16)

    xq = xq_ref[...]                                                     # (Tq, D) f32 (residual)

    # ---- Q projection for this query tile (1/sqrt(head_dim) folded into wq/bq). ----
    q = (jnp.dot(xq.astype(jnp.bfloat16), wq_ref[...],
                 preferred_element_type=jnp.float32)
         + bq_ref[...]).astype(jnp.bfloat16)                             # (Tq, D) bf16

    kv = kv_scratch[...]                                                 # (S, 2D) bf16

    # ---- multi-head attention: per-head score/softmax/ctx, heads concatenated,
    # then a single full-K out-projection matmul. ----
    # TODO(synk): attn_mask not implemented (module exercised with mask=None);
    #             attention-weight dropout skipped (eval-mode identity).
    # TODO(synk): per-head lane slices are only vreg-aligned when head_dim % 128 == 0;
    #             for other head dims Mosaic inserts lane relayouts.
    # TODO(synk): for very large num_heads, replace the unrolled Python loop with
    #             lax.fori_loop over 128-aligned dynamic slices to cap live ranges.
    dot_tt = (((1,), (1,)), ((), ()))       # contract last dims: A @ B.T, no transpose
    ctx_heads = []
    for h in range(num_heads):
        lo = h * hd
        hi = lo + hd
        qh = q[:, lo:hi]                         # (Tq, hd) bf16, pre-scaled
        kh = kv[:, lo:hi]                        # (S,  hd) bf16
        vh = kv[:, D + lo:D + hi]                # (S,  hd) bf16
        s = jax.lax.dot_general(qh, kh, dot_tt,
                                preferred_element_type=jnp.float32)      # (Tq, S) f32
        s = s - jnp.max(s, axis=-1, keepdims=True)
        p = jnp.exp(s)
        p = p * pl.reciprocal(jnp.sum(p, axis=-1, keepdims=True), approx=True)
        ctx_heads.append(jnp.dot(p.astype(jnp.bfloat16), vh,
                                 preferred_element_type=jnp.float32))    # (Tq, hd) f32
    ctx = jnp.concatenate(ctx_heads, axis=-1).astype(jnp.bfloat16)       # (Tq, D) bf16

    # Full contraction-depth (K = D) out-projection: one MXU matmul, wo loaded once.
    attn_out = jnp.dot(ctx, wo_ref[...],
                       preferred_element_type=jnp.float32) + bo_ref[...]

    # ---- residual + attention LayerNorm (f32 elementwise) ----
    y = _layernorm(attn_out + xq, g1_ref[...], be1_ref[...], norm_eps)

    # ---- feed-forward (Linear -> act -> Linear); dropout is eval-mode identity ----
    h1 = jnp.dot(y.astype(jnp.bfloat16), w1_ref[...],
                 preferred_element_type=jnp.float32) + bf1_ref[...]
    h1 = _gelu_tanh(h1) if is_gelu else jnp.maximum(h1, 0.0)
    h2 = jnp.dot(h1.astype(jnp.bfloat16), w2_ref[...],
                 preferred_element_type=jnp.float32) + bf2_ref[...]

    # ---- residual + FFN LayerNorm; single lane-dense (Tq, D) store ----
    o_ref[...] = _layernorm(h2 + y, g2_ref[...], be2_ref[...], norm_eps)


def self_attention_layer(x, params, *, num_heads, norm_eps, is_gelu, q_tile=None):
    B, S, D = x.shape
    (wqkv, bqkv, wo, bo, g1, be1, w1, bf1, w2, bf2, g2, be2) = params
    head_dim = D // num_heads

    # --- one-time weight transforms (wrapper-side, not per-token work) ---
    # Split the fused in-projection into Q and KV parts, fold 1/sqrt(head_dim) into the
    # Q columns, and store all weight matrices in bf16 (halved HBM traffic and VMEM
    # residency, native MXU input width).  Biases / norm params stay f32.
    scale = 1.0 / math.sqrt(head_dim)
    wq = (wqkv[:, :D] * scale).astype(jnp.bfloat16)
    bq = bqkv[:, :D] * scale
    wkv = wqkv[:, D:].astype(jnp.bfloat16)
    bkv = bqkv[:, D:]
    wo_b = wo.astype(jnp.bfloat16)
    w1_b = w1.astype(jnp.bfloat16)
    w2_b = w2.astype(jnp.bfloat16)

    # --- query-tile size: bounds the (Tq, S) scores and (Tq, 4D) FFN intermediate ---
    if q_tile is None:
        q_tile = S if S <= 256 else 256
    if S % q_tile != 0 or (q_tile != S and q_tile % 8 != 0):
        q_tile = S
    n_q = S // q_tile

    kern = partial(
        self_attention_layer_kernel,
        d_model=D, num_heads=num_heads, norm_eps=norm_eps, is_gelu=is_gelu,
    )

    def wspec(shape):
        # Constant-index weight/bias block: fetched once, resident across the grid.
        # Buffered(1): double-buffering a block whose index never changes buys nothing
        # and doubles its VMEM residency.
        return pl.BlockSpec(shape, lambda b, q, _n=len(shape): (0,) * _n,
                            pipeline_mode=pl.Buffered(1))

    in_specs = [
        pl.BlockSpec((None, q_tile, D), lambda b, q: (b, q, 0)),   # x: query tile
        pl.BlockSpec((None, S, D), lambda b, q: (b, 0, 0)),        # x: full seq for K/V
        wspec((D, D)), wspec((1, D)),              # wq, bq (scale folded)
        wspec((D, 2 * D)), wspec((1, 2 * D)),      # wkv, bkv
        wspec((D, D)), wspec((1, D)),              # out-proj
        wspec((1, D)), wspec((1, D)),              # attn_norm gamma/beta
        wspec((D, 4 * D)), wspec((1, 4 * D)),      # ffn linear 1
        wspec((4 * D, D)), wspec((1, D)),          # ffn linear 2
        wspec((1, D)), wspec((1, D)),              # ffn_norm gamma/beta
    ]

    # Advisory cost hint so XLA can schedule surrounding ops around this fused call.
    flops = B * (2 * S * D * (3 * D + D + 8 * D) + 4 * S * S * D)
    transcendentals = B * num_heads * S * S + B * S * 4 * D
    bytes_accessed = 12 * D * D * 2 + 3 * B * S * D * 4
    cost = pl.CostEstimate(flops=flops, transcendentals=transcendentals,
                           bytes_accessed=bytes_accessed)

    # VMEM budget: leave headroom below physical capacity (64 MiB/TC on v7x, 128 MiB on
    # v5e/v6e) for Mosaic internal scratch plus the activation pipeline buffers.
    try:
        vmem_cap = int(getattr(pltpu.get_tpu_info(), "vmem_capacity_bytes", 0)) or (128 << 20)
    except Exception:
        vmem_cap = 128 << 20
    vmem_limit = max(min(vmem_cap * 7 // 8, 112 * 1024 * 1024), 32 * 1024 * 1024)

    return pl.pallas_call(
        kern,
        out_shape=jax.ShapeDtypeStruct((B, S, D), jnp.float32),
        grid_spec=pltpu.PrefetchScalarGridSpec(
            num_scalar_prefetch=0,
            grid=(B, n_q),
            in_specs=in_specs,
            out_specs=pl.BlockSpec((None, q_tile, D), lambda b, q: (b, q, 0)),
            scratch_shapes=[pltpu.VMEM((S, 2 * D), jnp.bfloat16)],   # per-batch K/V cache
        ),
        # Batch axis shards across v7x's 2 TensorCores; the q-tile axis must stay
        # "arbitrary" because the K/V scratch written at q == 0 is reused across tiles.
        # TODO(synk): for B == 1 (or odd B) on v7x, mark the q axis "parallel" and
        #             recompute K/V per tile instead, to keep both TensorCores busy.
        compiler_params=pltpu.CompilerParams(
            dimension_semantics=("parallel", "arbitrary"),
            vmem_limit_bytes=int(vmem_limit),
        ),
        cost_estimate=cost,
    )(x, x, wq, bq, wkv, bkv, wo_b, bo, g1, be1, w1_b, bf1, w2_b, bf2, g2, be2)


def reference(x, params, *, num_heads, norm_eps, is_gelu):
    """Pure-JAX reference mirroring the PyTorch forward (eval mode, mask=None)."""
    wqkv, bqkv, wo, bo, g1, be1, w1, bf1, w2, bf2, g2, be2 = params
    B, S, D = x.shape
    hd = D // num_heads
    qkv = x @ wqkv + bqkv
    q, k, v = jnp.split(qkv, 3, axis=-1)

    def heads(t):
        return t.reshape(B, S, num_heads, hd).transpose(0, 2, 1, 3)

    qh, kh, vh = heads(q), heads(k), heads(v)
    s = jnp.einsum("bhqd,bhkd->bhqk", qh * (1.0 / math.sqrt(hd)), kh)
    p = jax.nn.softmax(s, axis=-1)
    ctx = jnp.einsum("bhqk,bhkd->bhqd", p, vh).transpose(0, 2, 1, 3).reshape(B, S, D)
    attn_out = ctx @ wo + bo
    y = _layernorm(attn_out + x, g1, be1, norm_eps)
    h1 = y @ w1 + bf1
    h1 = _gelu_tanh(h1) if is_gelu else jnp.maximum(h1, 0.0)
    h2 = h1 @ w2 + bf2
    return _layernorm(h2 + y, g2, be2, norm_eps)


if __name__ == "__main__":
    B, S, D, H = 2, 8, 32, 4          # batch, seq, d_model, num_heads
    NORM_EPS = 1e-5
    IS_GELU = True

    key = jax.random.PRNGKey(0)
    ks = jax.random.split(key, 13)
    w = 0.2
    params = (
        jax.random.normal(ks[0], (D, 3 * D), jnp.float32) * w,          # wqkv
        jax.random.normal(ks[1], (1, 3 * D), jnp.float32) * w,          # bqkv
        jax.random.normal(ks[2], (D, D), jnp.float32) * w,              # wo
        jax.random.normal(ks[3], (1, D), jnp.float32) * w,              # bo
        1.0 + jax.random.normal(ks[4], (1, D), jnp.float32) * 0.1,      # attn_norm gamma
        jax.random.normal(ks[5], (1, D), jnp.float32) * 0.1,            # attn_norm beta
        jax.random.normal(ks[6], (D, 4 * D), jnp.float32) * w,          # ffn w1
        jax.random.normal(ks[7], (1, 4 * D), jnp.float32) * w,          # ffn b1
        jax.random.normal(ks[8], (4 * D, D), jnp.float32) * w,          # ffn w2
        jax.random.normal(ks[9], (1, D), jnp.float32) * w,              # ffn b2
        1.0 + jax.random.normal(ks[10], (1, D), jnp.float32) * 0.1,     # ffn_norm gamma
        jax.random.normal(ks[11], (1, D), jnp.float32) * 0.1,           # ffn_norm beta
    )
    x = jax.random.normal(ks[12], (B, S, D), jnp.float32)

    out = self_attention_layer(x, params, num_heads=H, norm_eps=NORM_EPS, is_gelu=IS_GELU)
    out = jax.block_until_ready(out)

    # Reference uses the same bf16-rounded weight matrices the kernel streams, so the
    # comparison isolates kernel math (bf16 MXU accumulation + approx reciprocal) from
    # the deliberate weight quantization.
    def bf16_round(a):
        return a.astype(jnp.bfloat16).astype(jnp.float32)

    (wqkv, bqkv, wo, bo, g1, be1, w1, bf1, w2, bf2, g2, be2) = params
    ref_params = (bf16_round(wqkv), bqkv, bf16_round(wo), bo, g1, be1,
                  bf16_round(w1), bf1, bf16_round(w2), bf2, g2, be2)
    ref = reference(x, ref_params, num_heads=H, norm_eps=NORM_EPS, is_gelu=IS_GELU)

    assert out.shape == (B, S, D)
    # Tolerance sized for bf16 operand rounding + approx reciprocal in the softmax.
    assert jnp.allclose(out, ref, atol=2e-2, rtol=2e-2), float(jnp.abs(out - ref).max())

    print("KERNEL_OK")
</pallas_src>

<mosaic_0001>
module attributes {stable_mosaic.version = 11 : i64} {
  func.func @self_attention_layer_kernel(%arg0: i32, %arg1: i32, %arg2: memref<1x8x32xf32, #tpu.memory_space<vmem>>, %arg3: memref<1x8x32xf32, #tpu.memory_space<vmem>>, %arg4: memref<32x32xbf16, #tpu.memory_space<vmem>>, %arg5: memref<1x32xf32, #tpu.memory_space<vmem>>, %arg6: memref<32x64xbf16, #tpu.memory_space<vmem>>, %arg7: memref<1x64xf32, #tpu.memory_space<vmem>>, %arg8: memref<32x32xbf16, #tpu.memory_space<vmem>>, %arg9: memref<1x32xf32, #tpu.memory_space<vmem>>, %arg10: memref<1x32xf32, #tpu.memory_space<vmem>>, %arg11: memref<1x32xf32, #tpu.memory_space<vmem>>, %arg12: memref<32x128xbf16, #tpu.memory_space<vmem>>, %arg13: memref<1x128xf32, #tpu.memory_space<vmem>>, %arg14: memref<128x32xbf16, #tpu.memory_space<vmem>>, %arg15: memref<1x32xf32, #tpu.memory_space<vmem>>, %arg16: memref<1x32xf32, #tpu.memory_space<vmem>>, %arg17: memref<1x32xf32, #tpu.memory_space<vmem>>, %arg18: memref<1x8x32xf32, #tpu.memory_space<vmem>>, %arg19: memref<8x64xbf16, #tpu.memory_space<vmem>>) attributes {dimension_semantics = [#tpu.dimension_semantics<parallel>, #tpu.dimension_semantics<arbitrary>], iteration_bounds = array<i64: 2, 1>, scalar_prefetch = 0 : i64, scratch_operands = 1 : i64, tpu.core_type = #tpu.core_type<tc>, window_params = [{transform_indices = @transform_0, window_bounds = array<i64: 1, 8, 32>}, {transform_indices = @transform_1, window_bounds = array<i64: 1, 8, 32>}, {pipeline_mode = #tpu.pipeline_mode<synchronous>, transform_indices = @transform_2, window_bounds = array<i64: 32, 32>}, {pipeline_mode = #tpu.pipeline_mode<synchronous>, transform_indices = @transform_3, window_bounds = array<i64: 1, 32>}, {pipeline_mode = #tpu.pipeline_mode<synchronous>, transform_indices = @transform_4, window_bounds = array<i64: 32, 64>}, {pipeline_mode = #tpu.pipeline_mode<synchronous>, transform_indices = @transform_5, window_bounds = array<i64: 1, 64>}, {pipeline_mode = #tpu.pipeline_mode<synchronous>, transform_indices = @transform_6, window_bounds = array<i64: 32, 32>}, {pipeline_mode = #tpu.pipeline_mode<synchronous>, transform_indices = @transform_7, window_bounds = array<i64: 1, 32>}, {pipeline_mode = #tpu.pipeline_mode<synchronous>, transform_indices = @transform_8, window_bounds = array<i64: 1, 32>}, {pipeline_mode = #tpu.pipeline_mode<synchronous>, transform_indices = @transform_9, window_bounds = array<i64: 1, 32>}, {pipeline_mode = #tpu.pipeline_mode<synchronous>, transform_indices = @transform_10, window_bounds = array<i64: 32, 128>}, {pipeline_mode = #tpu.pipeline_mode<synchronous>, transform_indices = @transform_11, window_bounds = array<i64: 1, 128>}, {pipeline_mode = #tpu.pipeline_mode<synchronous>, transform_indices = @transform_12, window_bounds = array<i64: 128, 32>}, {pipeline_mode = #tpu.pipeline_mode<synchronous>, transform_indices = @transform_13, window_bounds = array<i64: 1, 32>}, {pipeline_mode = #tpu.pipeline_mode<synchronous>, transform_indices = @transform_14, window_bounds = array<i64: 1, 32>}, {pipeline_mode = #tpu.pipeline_mode<synchronous>, transform_indices = @transform_15, window_bounds = array<i64: 1, 32>}, {transform_indices = @transform_16, window_bounds = array<i64: 1, 8, 32>}]} {
    %c0_i32 = arith.constant 0 : i32
    %0 = arith.cmpi eq, %arg1, %c0_i32 : i32
    %1 = arith.extui %0 : i1 to i32
    %c0_i32_0 = arith.constant 0 : i32
    %2 = arith.cmpi ne, %1, %c0_i32_0 : i32
    scf.if %2 {
      %c0_65 = arith.constant 0 : index
      %c0_66 = arith.constant 0 : index
      %c0_67 = arith.constant 0 : index
      %162 = vector.load %arg3[%c0_65, %c0_66, %c0_67] : memref<1x8x32xf32, #tpu.memory_space<vmem>>, vector<1x8x32xf32>
      %163 = vector.shape_cast %162 : vector<1x8x32xf32> to vector<8x32xf32>
      %164 = arith.truncf %163 : vector<8x32xf32> to vector<8x32xbf16>
      %c0_68 = arith.constant 0 : index
      %c0_69 = arith.constant 0 : index
      %165 = vector.load %arg6[%c0_68, %c0_69] : memref<32x64xbf16, #tpu.memory_space<vmem>>, vector<32x64xbf16>
      %cst_70 = arith.constant dense<0.000000e+00> : vector<8x64xf32>
      %166 = tpu.matmul %164, %165, %cst_70 {dimension_numbers = #tpu.dot_dimension_numbers<[1], [0], [0], [1], [0, 0, 1, 1], [], []>} : vector<8x32xbf16>, vector<32x64xbf16>, vector<8x64xf32> -> vector<8x64xf32>
      %c0_71 = arith.constant 0 : index
      %c0_72 = arith.constant 0 : index
      %167 = vector.load %arg7[%c0_71, %c0_72] : memref<1x64xf32, #tpu.memory_space<vmem>>, vector<1x64xf32>
      %168 = vector.broadcast %167 : vector<1x64xf32> to vector<8x64xf32>
      %169 = arith.addf %166, %168 : vector<8x64xf32>
      %170 = arith.truncf %169 : vector<8x64xf32> to vector<8x64xbf16>
      %c0_73 = arith.constant 0 : index
      %c0_74 = arith.constant 0 : index
      %171 = vector.load %arg19[%c0_73, %c0_74] : memref<8x64xbf16, #tpu.memory_space<vmem>>, vector<8x64xbf16>
      tpu.vector_store %arg19[%c0_73, %c0_74], %170 {strides = array<i32>} : memref<8x64xbf16, #tpu.memory_space<vmem>>, vector<8x64xbf16>,
    } else {
    }
    %c0 = arith.constant 0 : index
    %c0_1 = arith.constant 0 : index
    %c0_2 = arith.constant 0 : index
    %3 = vector.load %arg2[%c0, %c0_1, %c0_2] : memref<1x8x32xf32, #tpu.memory_space<vmem>>, vector<1x8x32xf32>
    %4 = vector.shape_cast %3 : vector<1x8x32xf32> to vector<8x32xf32>
    %5 = arith.truncf %4 : vector<8x32xf32> to vector<8x32xbf16>
    %c0_3 = arith.constant 0 : index
    %c0_4 = arith.constant 0 : index
    %6 = vector.load %arg4[%c0_3, %c0_4] : memref<32x32xbf16, #tpu.memory_space<vmem>>, vector<32x32xbf16>
    %cst = arith.constant dense<0.000000e+00> : vector<8x32xf32>
    %7 = tpu.matmul %5, %6, %cst {dimension_numbers = #tpu.dot_dimension_numbers<[1], [0], [0], [1], [0, 0, 1, 1], [], []>} : vector<8x32xbf16>, vector<32x32xbf16>, vector<8x32xf32> -> vector<8x32xf32>
    %c0_5 = arith.constant 0 : index
    %c0_6 = arith.constant 0 : index
    %8 = vector.load %arg5[%c0_5, %c0_6] : memref<1x32xf32, #tpu.memory_space<vmem>>, vector<1x32xf32>
    %9 = vector.broadcast %8 : vector<1x32xf32> to vector<8x32xf32>
    %10 = arith.addf %7, %9 : vector<8x32xf32>
    %11 = arith.truncf %10 : vector<8x32xf32> to vector<8x32xbf16>
    %c0_7 = arith.constant 0 : index
    %c0_8 = arith.constant 0 : index
    %12 = vector.load %arg19[%c0_7, %c0_8] : memref<8x64xbf16, #tpu.memory_space<vmem>>, vector<8x64xbf16>
    %13 = vector.extract_strided_slice %11 {offsets = [0, 0], sizes = [8, 8], strides = [1, 1]} : vector<8x32xbf16> to vector<8x8xbf16>
    %14 = vector.extract_strided_slice %12 {offsets = [0, 0], sizes = [8, 8], strides = [1, 1]} : vector<8x64xbf16> to vector<8x8xbf16>
    %15 = vector.extract_strided_slice %12 {offsets = [0, 32], sizes = [8, 8], strides = [1, 1]} : vector<8x64xbf16> to vector<8x8xbf16>
    %cst_9 = arith.constant dense<0.000000e+00> : vector<8x8xf32>
    %16 = tpu.matmul %13, %14, %cst_9 {dimension_numbers = #tpu.dot_dimension_numbers<[1], [1], [0], [0], [0, 0, 1, 0], [], []>} : vector<8x8xbf16>, vector<8x8xbf16>, vector<8x8xf32> -> vector<8x8xf32>
    %cst_10 = arith.constant dense<0xFF800000> : vector<8xf32>
    %17 = vector.multi_reduction <maximumf>, %16, %cst_10 [1] : vector<8x8xf32> to vector<8xf32>
    %18 = vector.shape_cast %17 : vector<8xf32> to vector<8x1xf32>
    %19 = vector.broadcast %18 : vector<8x1xf32> to vector<8x8xf32>
    %20 = arith.subf %16, %19 : vector<8x8xf32>
    %21 = math.exp %20 : vector<8x8xf32>
    %cst_11 = arith.constant dense<0.000000e+00> : vector<8xf32>
    %22 = vector.multi_reduction <add>, %21, %cst_11 [1] : vector<8x8xf32> to vector<8xf32>
    %23 = vector.shape_cast %22 : vector<8xf32> to vector<8x1xf32>
    %24 = tpu.reciprocal %23 {approx = true} : vector<8x1xf32> -> vector<8x1xf32>
    %25 = vector.broadcast %24 : vector<8x1xf32> to vector<8x8xf32>
    %26 = arith.mulf %21, %25 : vector<8x8xf32>
    %27 = arith.truncf %26 : vector<8x8xf32> to vector<8x8xbf16>
    %cst_12 = arith.constant dense<0.000000e+00> : vector<8x8xf32>
    %28 = tpu.matmul %27, %15, %cst_12 {dimension_numbers = #tpu.dot_dimension_numbers<[1], [0], [0], [1], [0, 0, 1, 1], [], []>} : vector<8x8xbf16>, vector<8x8xbf16>, vector<8x8xf32> -> vector<8x8xf32>
    %29 = vector.extract_strided_slice %11 {offsets = [0, 8], sizes = [8, 8], strides = [1, 1]} : vector<8x32xbf16> to vector<8x8xbf16>
    %30 = vector.extract_strided_slice %12 {offsets = [0, 8], sizes = [8, 8], strides = [1, 1]} : vector<8x64xbf16> to vector<8x8xbf16>
    %31 = vector.extract_strided_slice %12 {offsets = [0, 40], sizes = [8, 8], strides = [1, 1]} : vector<8x64xbf16> to vector<8x8xbf16>
    %cst_13 = arith.constant dense<0.000000e+00> : vector<8x8xf32>
    %32 = tpu.matmul %29, %30, %cst_13 {dimension_numbers = #tpu.dot_dimension_numbers<[1], [1], [0], [0], [0, 0, 1, 0], [], []>} : vector<8x8xbf16>, vector<8x8xbf16>, vector<8x8xf32> -> vector<8x8xf32>
    %cst_14 = arith.constant dense<0xFF800000> : vector<8xf32>
    %33 = vector.multi_reduction <maximumf>, %32, %cst_14 [1] : vector<8x8xf32> to vector<8xf32>
    %34 = vector.shape_cast %33 : vector<8xf32> to vector<8x1xf32>
    %35 = vector.broadcast %34 : vector<8x1xf32> to vector<8x8xf32>
    %36 = arith.subf %32, %35 : vector<8x8xf32>
    %37 = math.exp %36 : vector<8x8xf32>
    %cst_15 = arith.constant dense<0.000000e+00> : vector<8xf32>
    %38 = vector.multi_reduction <add>, %37, %cst_15 [1] : vector<8x8xf32> to vector<8xf32>
    %39 = vector.shape_cast %38 : vector<8xf32> to vector<8x1xf32>
    %40 = tpu.reciprocal %39 {approx = true} : vector<8x1xf32> -> vector<8x1xf32>
    %41 = vector.broadcast %40 : vector<8x1xf32> to vector<8x8xf32>
    %42 = arith.mulf %37, %41 : vector<8x8xf32>
    %43 = arith.truncf %42 : vector<8x8xf32> to vector<8x8xbf16>
    %cst_16 = arith.constant dense<0.000000e+00> : vector<8x8xf32>
    %44 = tpu.matmul %43, %31, %cst_16 {dimension_numbers = #tpu.dot_dimension_numbers<[1], [0], [0], [1], [0, 0, 1, 1], [], []>} : vector<8x8xbf16>, vector<8x8xbf16>, vector<8x8xf32> -> vector<8x8xf32>
    %45 = vector.extract_strided_slice %11 {offsets = [0, 16], sizes = [8, 8], strides = [1, 1]} : vector<8x32xbf16> to vector<8x8xbf16>
    %46 = vector.extract_strided_slice %12 {offsets = [0, 16], sizes = [8, 8], strides = [1, 1]} : vector<8x64xbf16> to vector<8x8xbf16>
    %47 = vector.extract_strided_slice %12 {offsets = [0, 48], sizes = [8, 8], strides = [1, 1]} : vector<8x64xbf16> to vector<8x8xbf16>
    %cst_17 = arith.constant dense<0.000000e+00> : vector<8x8xf32>
    %48 = tpu.matmul %45, %46, %cst_17 {dimension_numbers = #tpu.dot_dimension_numbers<[1], [1], [0], [0], [0, 0, 1, 0], [], []>} : vector<8x8xbf16>, vector<8x8xbf16>, vector<8x8xf32> -> vector<8x8xf32>
    %cst_18 = arith.constant dense<0xFF800000> : vector<8xf32>
    %49 = vector.multi_reduction <maximumf>, %48, %cst_18 [1] : vector<8x8xf32> to vector<8xf32>
    %50 = vector.shape_cast %49 : vector<8xf32> to vector<8x1xf32>
    %51 = vector.broadcast %50 : vector<8x1xf32> to vector<8x8xf32>
    %52 = arith.subf %48, %51 : vector<8x8xf32>
    %53 = math.exp %52 : vector<8x8xf32>
    %cst_19 = arith.constant dense<0.000000e+00> : vector<8xf32>
    %54 = vector.multi_reduction <add>, %53, %cst_19 [1] : vector<8x8xf32> to vector<8xf32>
    %55 = vector.shape_cast %54 : vector<8xf32> to vector<8x1xf32>
    %56 = tpu.reciprocal %55 {approx = true} : vector<8x1xf32> -> vector<8x1xf32>
    %57 = vector.broadcast %56 : vector<8x1xf32> to vector<8x8xf32>
    %58 = arith.mulf %53, %57 : vector<8x8xf32>
    %59 = arith.truncf %58 : vector<8x8xf32> to vector<8x8xbf16>
    %cst_20 = arith.constant dense<0.000000e+00> : vector<8x8xf32>
    %60 = tpu.matmul %59, %47, %cst_20 {dimension_numbers = #tpu.dot_dimension_numbers<[1], [0], [0], [1], [0, 0, 1, 1], [], []>} : vector<8x8xbf16>, vector<8x8xbf16>, vector<8x8xf32> -> vector<8x8xf32>
    %61 = vector.extract_strided_slice %11 {offsets = [0, 24], sizes = [8, 8], strides = [1, 1]} : vector<8x32xbf16> to vector<8x8xbf16>
    %62 = vector.extract_strided_slice %12 {offsets = [0, 24], sizes = [8, 8], strides = [1, 1]} : vector<8x64xbf16> to vector<8x8xbf16>
    %63 = vector.extract_strided_slice %12 {offsets = [0, 56], sizes = [8, 8], strides = [1, 1]} : vector<8x64xbf16> to vector<8x8xbf16>
    %cst_21 = arith.constant dense<0.000000e+00> : vector<8x8xf32>
    %64 = tpu.matmul %61, %62, %cst_21 {dimension_numbers = #tpu.dot_dimension_numbers<[1], [1], [0], [0], [0, 0, 1, 0], [], []>} : vector<8x8xbf16>, vector<8x8xbf16>, vector<8x8xf32> -> vector<8x8xf32>
    %cst_22 = arith.constant dense<0xFF800000> : vector<8xf32>
    %65 = vector.multi_reduction <maximumf>, %64, %cst_22 [1] : vector<8x8xf32> to vector<8xf32>
    %66 = vector.shape_cast %65 : vector<8xf32> to vector<8x1xf32>
    %67 = vector.broadcast %66 : vector<8x1xf32> to vector<8x8xf32>
    %68 = arith.subf %64, %67 : vector<8x8xf32>
    %69 = math.exp %68 : vector<8x8xf32>
    %cst_23 = arith.constant dense<0.000000e+00> : vector<8xf32>
    %70 = vector.multi_reduction <add>, %69, %cst_23 [1] : vector<8x8xf32> to vector<8xf32>
    %71 = vector.shape_cast %70 : vector<8xf32> to vector<8x1xf32>
    %72 = tpu.reciprocal %71 {approx = true} : vector<8x1xf32> -> vector<8x1xf32>
    %73 = vector.broadcast %72 : vector<8x1xf32> to vector<8x8xf32>
    %74 = arith.mulf %69, %73 : vector<8x8xf32>
    %75 = arith.truncf %74 : vector<8x8xf32> to vector<8x8xbf16>
    %cst_24 = arith.constant dense<0.000000e+00> : vector<8x8xf32>
    %76 = tpu.matmul %75, %63, %cst_24 {dimension_numbers = #tpu.dot_dimension_numbers<[1], [0], [0], [1], [0, 0, 1, 1], [], []>} : vector<8x8xbf16>, vector<8x8xbf16>, vector<8x8xf32> -> vector<8x8xf32>
    %77 = tpu.concatenate %28, %44, %60, %76 in 1 : vector<8x8xf32>, vector<8x8xf32>, vector<8x8xf32>, vector<8x8xf32> -> vector<8x32xf32>
    %78 = arith.truncf %77 : vector<8x32xf32> to vector<8x32xbf16>
    %c0_25 = arith.constant 0 : index
    %c0_26 = arith.constant 0 : index
    %79 = vector.load %arg8[%c0_25, %c0_26] : memref<32x32xbf16, #tpu.memory_space<vmem>>, vector<32x32xbf16>
    %cst_27 = arith.constant dense<0.000000e+00> : vector<8x32xf32>
    %80 = tpu.matmul %78, %79, %cst_27 {dimension_numbers = #tpu.dot_dimension_numbers<[1], [0], [0], [1], [0, 0, 1, 1], [], []>} : vector<8x32xbf16>, vector<32x32xbf16>, vector<8x32xf32> -> vector<8x32xf32>
    %c0_28 = arith.constant 0 : index
    %c0_29 = arith.constant 0 : index
    %81 = vector.load %arg9[%c0_28, %c0_29] : memref<1x32xf32, #tpu.memory_space<vmem>>, vector<1x32xf32>
    %82 = vector.broadcast %81 : vector<1x32xf32> to vector<8x32xf32>
    %83 = arith.addf %80, %82 : vector<8x32xf32>
    %84 = arith.addf %83, %4 : vector<8x32xf32>
    %c0_30 = arith.constant 0 : index
    %c0_31 = arith.constant 0 : index
    %85 = vector.load %arg10[%c0_30, %c0_31] : memref<1x32xf32, #tpu.memory_space<vmem>>, vector<1x32xf32>
    %c0_32 = arith.constant 0 : index
    %c0_33 = arith.constant 0 : index
    %86 = vector.load %arg11[%c0_32, %c0_33] : memref<1x32xf32, #tpu.memory_space<vmem>>, vector<1x32xf32>
    %cst_34 = arith.constant dense<0.000000e+00> : vector<8xf32>
    %87 = vector.multi_reduction <add>, %84, %cst_34 [1] : vector<8x32xf32> to vector<8xf32>
    %88 = vector.shape_cast %87 : vector<8xf32> to vector<8x1xf32>
    %cst_35 = arith.constant 3.200000e+01 : f32
    %89 = vector.broadcast %cst_35 : f32 to vector<8x1xf32>
    %90 = arith.divf %88, %89 : vector<8x1xf32>
    %91 = vector.broadcast %90 : vector<8x1xf32> to vector<8x32xf32>
    %92 = arith.subf %84, %91 : vector<8x32xf32>
    %93 = arith.mulf %92, %92 : vector<8x32xf32>
    %cst_36 = arith.constant dense<0.000000e+00> : vector<8xf32>
    %94 = vector.multi_reduction <add>, %93, %cst_36 [1] : vector<8x32xf32> to vector<8xf32>
    %95 = vector.shape_cast %94 : vector<8xf32> to vector<8x1xf32>
    %cst_37 = arith.constant 3.200000e+01 : f32
    %96 = vector.broadcast %cst_37 : f32 to vector<8x1xf32>
    %97 = arith.divf %95, %96 : vector<8x1xf32>
    %98 = vector.broadcast %90 : vector<8x1xf32> to vector<8x32xf32>
    %99 = arith.subf %84, %98 : vector<8x32xf32>
    %cst_38 = arith.constant 9.99999974E-6 : f32
    %100 = vector.broadcast %cst_38 : f32 to vector<8x1xf32>
    %101 = arith.addf %97, %100 : vector<8x1xf32>
    %102 = math.rsqrt %101 : vector<8x1xf32>
    %103 = vector.broadcast %102 : vector<8x1xf32> to vector<8x32xf32>
    %104 = arith.mulf %99, %103 : vector<8x32xf32>
    %105 = vector.broadcast %85 : vector<1x32xf32> to vector<8x32xf32>
    %106 = arith.mulf %104, %105 : vector<8x32xf32>
    %107 = vector.broadcast %86 : vector<1x32xf32> to vector<8x32xf32>
    %108 = arith.addf %106, %107 : vector<8x32xf32>
    %109 = arith.truncf %108 : vector<8x32xf32> to vector<8x32xbf16>
    %c0_39 = arith.constant 0 : index
    %c0_40 = arith.constant 0 : index
    %110 = vector.load %arg12[%c0_39, %c0_40] : memref<32x128xbf16, #tpu.memory_space<vmem>>, vector<32x128xbf16>
    %cst_41 = arith.constant dense<0.000000e+00> : vector<8x128xf32>
    %111 = tpu.matmul %109, %110, %cst_41 {dimension_numbers = #tpu.dot_dimension_numbers<[1], [0], [0], [1], [0, 0, 1, 1], [], []>} : vector<8x32xbf16>, vector<32x128xbf16>, vector<8x128xf32> -> vector<8x128xf32>
    %c0_42 = arith.constant 0 : index
    %c0_43 = arith.constant 0 : index
    %112 = vector.load %arg13[%c0_42, %c0_43] : memref<1x128xf32, #tpu.memory_space<vmem>>, vector<1x128xf32>
    %113 = vector.broadcast %112 : vector<1x128xf32> to vector<8x128xf32>
    %114 = arith.addf %111, %113 : vector<8x128xf32>
    %cst_44 = arith.constant 5.000000e-01 : f32
    %115 = vector.broadcast %cst_44 : f32 to vector<8x128xf32>
    %116 = arith.mulf %115, %114 : vector<8x128xf32>
    %cst_45 = arith.constant 4.471500e-02 : f32
    %117 = vector.broadcast %cst_45 : f32 to vector<8x128xf32>
    %118 = arith.mulf %117, %114 : vector<8x128xf32>
    %119 = arith.mulf %118, %114 : vector<8x128xf32>
    %120 = arith.mulf %119, %114 : vector<8x128xf32>
    %121 = arith.addf %114, %120 : vector<8x128xf32>
    %cst_46 = arith.constant 0.797884583 : f32
    %122 = vector.broadcast %cst_46 : f32 to vector<8x128xf32>
    %123 = arith.mulf %122, %121 : vector<8x128xf32>
    %124 = math.tanh %123 : vector<8x128xf32>
    %cst_47 = arith.constant 1.000000e+00 : f32
    %125 = vector.broadcast %cst_47 : f32 to vector<8x128xf32>
    %126 = arith.addf %125, %124 : vector<8x128xf32>
    %127 = arith.mulf %116, %126 : vector<8x128xf32>
    %128 = arith.truncf %127 : vector<8x128xf32> to vector<8x128xbf16>
    %c0_48 = arith.constant 0 : index
    %c0_49 = arith.constant 0 : index
    %129 = vector.load %arg14[%c0_48, %c0_49] : memref<128x32xbf16, #tpu.memory_space<vmem>>, vector<128x32xbf16>
    %cst_50 = arith.constant dense<0.000000e+00> : vector<8x32xf32>
    %130 = tpu.matmul %128, %129, %cst_50 {dimension_numbers = #tpu.dot_dimension_numbers<[1], [0], [0], [1], [0, 0, 1, 1], [], []>} : vector<8x128xbf16>, vector<128x32xbf16>, vector<8x32xf32> -> vector<8x32xf32>
    %c0_51 = arith.constant 0 : index
    %c0_52 = arith.constant 0 : index
    %131 = vector.load %arg15[%c0_51, %c0_52] : memref<1x32xf32, #tpu.memory_space<vmem>>, vector<1x32xf32>
    %132 = vector.broadcast %131 : vector<1x32xf32> to vector<8x32xf32>
    %133 = arith.addf %130, %132 : vector<8x32xf32>
    %134 = arith.addf %133, %108 : vector<8x32xf32>
    %c0_53 = arith.constant 0 : index
    %c0_54 = arith.constant 0 : index
    %135 = vector.load %arg16[%c0_53, %c0_54] : memref<1x32xf32, #tpu.memory_space<vmem>>, vector<1x32xf32>
    %c0_55 = arith.constant 0 : index
    %c0_56 = arith.constant 0 : index
    %136 = vector.load %arg17[%c0_55, %c0_56] : memref<1x32xf32, #tpu.memory_space<vmem>>, vector<1x32xf32>
    %cst_57 = arith.constant dense<0.000000e+00> : vector<8xf32>
    %137 = vector.multi_reduction <add>, %134, %cst_57 [1] : vector<8x32xf32> to vector<8xf32>
    %138 = vector.shape_cast %137 : vector<8xf32> to vector<8x1xf32>
    %cst_58 = arith.constant 3.200000e+01 : f32
    %139 = vector.broadcast %cst_58 : f32 to vector<8x1xf32>
    %140 = arith.divf %138, %139 : vector<8x1xf32>
    %141 = vector.broadcast %140 : vector<8x1xf32> to vector<8x32xf32>
    %142 = arith.subf %134, %141 : vector<8x32xf32>
    %143 = arith.mulf %142, %142 : vector<8x32xf32>
    %cst_59 = arith.constant dense<0.000000e+00> : vector<8xf32>
    %144 = vector.multi_reduction <add>, %143, %cst_59 [1] : vector<8x32xf32> to vector<8xf32>
    %145 = vector.shape_cast %144 : vector<8xf32> to vector<8x1xf32>
    %cst_60 = arith.constant 3.200000e+01 : f32
    %146 = vector.broadcast %cst_60 : f32 to vector<8x1xf32>
    %147 = arith.divf %145, %146 : vector<8x1xf32>
    %148 = vector.broadcast %140 : vector<8x1xf32> to vector<8x32xf32>
    %149 = arith.subf %134, %148 : vector<8x32xf32>
    %cst_61 = arith.constant 9.99999974E-6 : f32
    %150 = vector.broadcast %cst_61 : f32 to vector<8x1xf32>
    %151 = arith.addf %147, %150 : vector<8x1xf32>
    %152 = math.rsqrt %151 : vector<8x1xf32>
    %153 = vector.broadcast %152 : vector<8x1xf32> to vector<8x32xf32>
    %154 = arith.mulf %149, %153 : vector<8x32xf32>
    %155 = vector.broadcast %135 : vector<1x32xf32> to vector<8x32xf32>
    %156 = arith.mulf %154, %155 : vector<8x32xf32>
    %157 = vector.broadcast %136 : vector<1x32xf32> to vector<8x32xf32>
    %158 = arith.addf %156, %157 : vector<8x32xf32>
    %c0_62 = arith.constant 0 : index
    %c0_63 = arith.constant 0 : index
    %c0_64 = arith.constant 0 : index
    %159 = vector.load %arg18[%c0_62, %c0_63, %c0_64] : memref<1x8x32xf32, #tpu.memory_space<vmem>>, vector<1x8x32xf32>
    %160 = vector.shape_cast %159 : vector<1x8x32xf32> to vector<8x32xf32>
    %161 = vector.shape_cast %158 : vector<8x32xf32> to vector<1x8x32xf32>
    tpu.vector_store %arg18[%c0_62, %c0_63, %c0_64], %161 {strides = array<i32>} : memref<1x8x32xf32, #tpu.memory_space<vmem>>, vector<1x8x32xf32>,
    return
  }
  func.func @transform_0(%arg0: i32, %arg1: i32) -> (i32, i32, i32) {
    %c0_i32 = arith.constant 0 : i32
    %c0_i32_0 = arith.constant 0 : i32
    return %arg0, %arg1, %c0_i32 : i32, i32, i32
  }
  func.func @transform_1(%arg0: i32, %arg1: i32) -> (i32, i32, i32) {
    %c0_i32 = arith.constant 0 : i32
    %c0_i32_0 = arith.constant 0 : i32
    %c0_i32_1 = arith.constant 0 : i32
    return %arg0, %c0_i32, %c0_i32_0 : i32, i32, i32
  }
  func.func @transform_2(%arg0: i32, %arg1: i32) -> (i32, i32) {
    %c0_i32 = arith.constant 0 : i32
    %c0_i32_0 = arith.constant 0 : i32
    %c0_i32_1 = arith.constant 0 : i32
    return %c0_i32, %c0_i32_0 : i32, i32
  }
  func.func @transform_3(%arg0: i32, %arg1: i32) -> (i32, i32) {
    %c0_i32 = arith.constant 0 : i32
    %c0_i32_0 = arith.constant 0 : i32
    %c0_i32_1 = arith.constant 0 : i32
    return %c0_i32, %c0_i32_0 : i32, i32
  }
  func.func @transform_4(%arg0: i32, %arg1: i32) -> (i32, i32) {
    %c0_i32 = arith.constant 0 : i32
    %c0_i32_0 = arith.constant 0 : i32
    %c0_i32_1 = arith.constant 0 : i32
    return %c0_i32, %c0_i32_0 : i32, i32
  }
  func.func @transform_5(%arg0: i32, %arg1: i32) -> (i32, i32) {
    %c0_i32 = arith.constant 0 : i32
    %c0_i32_0 = arith.constant 0 : i32
    %c0_i32_1 = arith.constant 0 : i32
    return %c0_i32, %c0_i32_0 : i32, i32
  }
  func.func @transform_6(%arg0: i32, %arg1: i32) -> (i32, i32) {
    %c0_i32 = arith.constant 0 : i32
    %c0_i32_0 = arith.constant 0 : i32
    %c0_i32_1 = arith.constant 0 : i32
    return %c0_i32, %c0_i32_0 : i32, i32
  }
  func.func @transform_7(%arg0: i32, %arg1: i32) -> (i32, i32) {
    %c0_i32 = arith.constant 0 : i32
    %c0_i32_0 = arith.constant 0 : i32
    %c0_i32_1 = arith.constant 0 : i32
    return %c0_i32, %c0_i32_0 : i32, i32
  }
  func.func @transform_8(%arg0: i32, %arg1: i32) -> (i32, i32) {
    %c0_i32 = arith.constant 0 : i32
    %c0_i32_0 = arith.constant 0 : i32
    %c0_i32_1 = arith.constant 0 : i32
    return %c0_i32, %c0_i32_0 : i32, i32
  }
  func.func @transform_9(%arg0: i32, %arg1: i32) -> (i32, i32) {
    %c0_i32 = arith.constant 0 : i32
    %c0_i32_0 = arith.constant 0 : i32
    %c0_i32_1 = arith.constant 0 : i32
    return %c0_i32, %c0_i32_0 : i32, i32
  }
  func.func @transform_10(%arg0: i32, %arg1: i32) -> (i32, i32) {
    %c0_i32 = arith.constant 0 : i32
    %c0_i32_0 = arith.constant 0 : i32
    %c0_i32_1 = arith.constant 0 : i32
    return %c0_i32, %c0_i32_0 : i32, i32
  }
  func.func @transform_11(%arg0: i32, %arg1: i32) -> (i32, i32) {
    %c0_i32 = arith.constant 0 : i32
    %c0_i32_0 = arith.constant 0 : i32
    %c0_i32_1 = arith.constant 0 : i32
    return %c0_i32, %c0_i32_0 : i32, i32
  }
  func.func @transform_12(%arg0: i32, %arg1: i32) -> (i32, i32) {
    %c0_i32 = arith.constant 0 : i32
    %c0_i32_0 = arith.constant 0 : i32
    %c0_i32_1 = arith.constant 0 : i32
    return %c0_i32, %c0_i32_0 : i32, i32
  }
  func.func @transform_13(%arg0: i32, %arg1: i32) -> (i32, i32) {
    %c0_i32 = arith.constant 0 : i32
    %c0_i32_0 = arith.constant 0 : i32
    %c0_i32_1 = arith.constant 0 : i32
    return %c0_i32, %c0_i32_0 : i32, i32
  }
  func.func @transform_14(%arg0: i32, %arg1: i32) -> (i32, i32) {
    %c0_i32 = arith.constant 0 : i32
    %c0_i32_0 = arith.constant 0 : i32
    %c0_i32_1 = arith.constant 0 : i32
    return %c0_i32, %c0_i32_0 : i32, i32
  }
  func.func @transform_15(%arg0: i32, %arg1: i32) -> (i32, i32) {
    %c0_i32 = arith.constant 0 : i32
    %c0_i32_0 = arith.constant 0 : i32
    %c0_i32_1 = arith.constant 0 : i32
    return %c0_i32, %c0_i32_0 : i32, i32
  }
  func.func @transform_16(%arg0: i32, %arg1: i32) -> (i32, i32, i32) {
    %c0_i32 = arith.constant 0 : i32
    %c0_i32_0 = arith.constant 0 : i32
    return %arg0, %arg1, %c0_i32 : i32, i32, i32
  }
}

</mosaic_0001>

<bundles_post_ra>
// kernel: tpu_custom_call.1
= control target key start
LH: loop header
LB: loop body
LE: loop exit
PB: predicated region body
PF: predicated region fallthrough
CT: control target
= control target key end

     0   :  { %s3769_s0 = inlined_call_operand.hbm [shape: f32[2,8,32], index: 0, kind: input, shape index: {}]   ;;  %s3770_s1 = inlined_call_operand.hbm [shape: f32[2,8,32], index: 1, kind: input, shape index: {}]   ;;  %s3771_s2 = inlined_call_operand.hbm [shape: bf16[32,32], index: 2, kind: input, shape index: {}]   ;;  %s3772_s3 = inlined_call_operand.hbm [shape: f32[1,32], index: 3, kind: input, shape index: {}]   ;;  %s3773_s4 = inlined_call_operand.hbm [shape: bf16[32,64], index: 4, kind: input, shape index: {}]   ;;  %s3774_s5 = inlined_call_operand.hbm [shape: f32[1,64], index: 5, kind: input, shape index: {}]   ;;  %s3775_s6 = inlined_call_operand.hbm [shape: bf16[32,32], index: 6, kind: input, shape index: {}]   ;;  %s3776_s7 = inlined_call_operand.hbm [shape: f32[1,32], index: 7, kind: input, shape index: {}]   ;;  %s3777_s8 = inlined_call_operand.hbm [shape: f32[1,32], index: 8, kind: input, shape index: {}]   ;;  %s3778_s9 = inlined_call_operand.hbm [shape: f32[1,32], index: 9, kind: input, shape index: {}]   ;;  %s3779_s10 = inlined_call_operand.hbm [shape: bf16[32,128], index: 10, kind: input, shape index: {}]   ;;  %s3780_s11 = inlined_call_operand.hbm [shape: f32[1,128], index: 11, kind: input, shape index: {}]   ;;  %s3781_s12 = inlined_call_operand.hbm [shape: bf16[128,32], index: 12, kind: input, shape index: {}]   ;;  %s3782_s13 = inlined_call_operand.hbm [shape: f32[1,32], index: 13, kind: input, shape index: {}]   ;;  %s3783_s14 = inlined_call_operand.hbm [shape: f32[1,32], index: 14, kind: input, shape index: {}]   ;;  %s3784_s15 = inlined_call_operand.hbm [shape: f32[1,32], index: 15, kind: input, shape index: {}]   ;;  %s3785_s16 = inlined_call_operand.hbm [shape: f32[2,8,32], index: 16, kind: output, shape index: {}]  }
   0x1   :  { %3802 = sst [smem:[#allocation48_spill]] %s3769_s0 }
   0x2   :  { %3803 = sst [smem:[#allocation49_spill]] %s3770_s1 }
   0x3   :  { %3804 = sst [smem:[#allocation50_spill]] %s3771_s2 }
   0x4   :  { %3805 = sst [smem:[#allocation51_spill]] %s3772_s3 }
   0x5   :  { %3806 = sst [smem:[#allocation52_spill]] %s3773_s4 }
   0x6   :  { %3807 = sst [smem:[#allocation53_spill]] %s3774_s5 }
   0x7   :  { %3808 = sst [smem:[#allocation54_spill]] %s3775_s6 }
   0x8   :  { %3809 = sst [smem:[#allocation55_spill]] %s3776_s7 }
   0x9   :  { %3810 = sst [smem:[#allocation56_spill]] %s3777_s8 }
   0xa   :  { %3811 = sst [smem:[#allocation57_spill]] %s3785_s16 }
   0xb   :  { %21 = vsyncpa [#allocation4], 0 }
   0xc   :  { %23 = vsyncpa [#allocation4 + $0x1], 0 }
   0xd   :  { %24 = vsyncpa [#allocation7], 0 }
   0xe   :  { %26 = vsyncpa [#allocation7 + $0x1], 0 }
   0xf   :  { %27 = vsyncpa [#allocation10], 0 }
  0x10   :  { %28 = vsyncpa [#allocation13], 0 }
  0x11   :  { %29 = vsyncpa [#allocation16], 0 }
  0x12   :  { %30 = vsyncpa [#allocation19], 0 }
  0x13   :  { %31 = vsyncpa [#allocation22], 0 }
  0x14   :  { %32 = vsyncpa [#allocation25], 0 }
  0x15   :  { %33 = vsyncpa [#allocation28], 0 }
  0x16   :  { %34 = vsyncpa [#allocation5], 0 }
  0x17   :  { %36 = vsyncpa [#allocation5 + $0x1], 0  ;;  %s3119_s21 = smov 0   ;;  %s3121_s22 = smov 0  }
  0x18   :  { %s3123_s23 = smov 0   ;;  %s3125_s24 = smov 0  }
  0x19   :  { %s3127_s25 = smov 0   ;;  %s3129_s26 = smov 0  }
  0x1a LB: > { %3812 = sst [smem:[#allocation41_spill]] %s2981_s21  ;;  %s3150_s27 = sadd.s32 4294967295, %s3001_s26   ;;  %s3001_s26 = sphi %s3129_s26, %s42_s26   ;;  %s2997_s25 = sphi %s3127_s25, %s3875_s25   ;;  %s2993_s24 = sphi %s3125_s24, %s3873_s24   ;;  %s2989_s23 = sphi %s3123_s23, %s3874_s23   ;;  %s2985_s22 = sphi %s3121_s22, %s3872_s22   ;;  %s2981_s21 = sphi %s3119_s21, %s3871_s21  }
  0x1b   : > { %3813 = sst [smem:[#allocation42_spill]] %s2985_s22  ;;  %p1953_p0 = scmp.ge.s32.totalorder %s3001_s26, 1 }
  0x1c   : > { %3814 = sst [smem:[#allocation43_spill]] %s2989_s23  ;;  %p3796_p1 = scmp.eq.s32.totalorder %s3150_s27, 0 }
  0x1d   : > { %3815 = sst [smem:[#allocation44_spill]] %s2993_s24  ;;  %p435_p2 = scmp.lt.s32.totalorder %s3001_s26, 3 }
  0x1e   : > { %3816 = sst [smem:[#allocation45_spill]] %s2997_s25  ;;  %s3003_s29 = smov [#allocation8]  }
  0x1f   : > { %3817 = sst [smem:[#allocation46_spill]] %s3150_s27  ;;  %p3155_p3 = pnand %p1953_p0, %p435_p2 }
  0x20   : > { %s447_s30 = sshll.u32 %s3003_s29, 4  ;;  %s3004_s17 = smov [#allocation9]   ;;  %s3159_s30 = int_to_ptr.vmem [resolvable:$true] %s447_s30 }
  0x21   : > { %s3818_s28 = scalar_select %p3155_p3, 1, 0 }
  0x22   : > { %p2232_p4 = pneg %p3155_p3  ;;  %s461_s18 = sshll.u32 %s3004_s17, 4  ;;  %s3170_s18 = int_to_ptr.vmem [resolvable:$true] %s461_s18 }
  0x23   : > { %3819 = sst [smem:[#allocation47_spill]] %s3818_s28  ;;  %s3005_s19 = smov [#allocation12]  }
  0x24   : > { %p3166_p6 = pnand %p2232_p4, %p3796_p1  ;;  %s3172_s20 = sshll.u32 %s3005_s19, 4  ;;  %s486_s20 = int_to_ptr.vmem [resolvable:$true] %s3172_s20 }
  0x25   : > { %s3821_s2 = sld [smem:[#allocation50_spill]] }
  0x26   : > { %p3182_p8 = pneg %p3166_p6 }
  0x2b   : > { %s2431_s24 = scalar_lea.hbm %s3821_s2, 256 }
  0x2c   : > { %p2432_p7 = scmp.ne.s32.totalorder %s3821_s2, %s2431_s24  ;;  %p2438_p11 = scmp.lt.u32.totalorder %s2431_s24, %s3821_s2 }
  0x2e   : > { %p2434_p9 = pnand %p3182_p8, %p2432_p7 }
  0x30   : > { %p2435_p10 = pneg %p2434_p9 }
  0x32   : > { %p2440_p12 = pnand %p2438_p11, %p2435_p10 }
  0x34   : > { %2443 = shalt.err (!%p2440_p12)
}
  0x35   : > { %s2444_s1 = scalar_lea.vmem %s3159_s30, 256  ;;  %p2452_p4 = scmp.lt.s32.totalorder %s3159_s30, %s3159_s30 }
  0x36   : > { %p2445_p13 = scmp.ne.s32.totalorder %s3159_s30, %s2444_s1  ;;  %p2453_p5 = scmp.lt.s32.totalorder %s2444_s1, %s2444_s1 }
  0x38   : > { %p2447_p0 = pnand %p2445_p13, %p3182_p8  ;;  %p2454_p7 = por %p2453_p5, %p2452_p4 }
  0x3a   : > { %p2448_p2 = pneg %p2447_p0 }
  0x3c   : > { %p2455_p9 = pnand %p2454_p7, %p2448_p2 }
  0x3e   : > { %2458 = shalt.err (!%p2455_p9)
}
  0x3f   : > { %s3798_s16 = smov 64   ;;  %s3007_s24 = smov 4  }
  0x40   : > { %2235 = dma.hbm_to_vmem [thread:$0]  (!%p3166_p6), %s3821_s2, 256, %s3159_s30, [#allocation7], %s3798_s16, %s3798_s16, %s3007_s24  }
  0x41   : > { %s3823_s3 = sld [smem:[#allocation51_spill]] }
  0x47   : > { %s2459_s1 = scalar_lea.hbm %s3823_s3, 16 }
  0x48   : > { %p2460_p5 = scmp.ne.s32.totalorder %s3823_s3, %s2459_s1  ;;  %p2466_p12 = scmp.lt.u32.totalorder %s2459_s1, %s3823_s3 }
  0x4a   : > { %p2462_p10 = pnand %p2460_p5, %p3182_p8 }
  0x4c   : > { %p2463_p11 = pneg %p2462_p10 }
  0x4e   : > { %p2468_p13 = pnand %p2466_p12, %p2463_p11 }
  0x50   : > { %2471 = shalt.err (!%p2468_p13)
}
  0x51   : > { %s2472_s30 = scalar_lea.vmem %s3170_s18, 16  ;;  %s2479_s21 = scalar_lea.vmem %s3170_s18, 32 }
  0x52   : > { %p2473_p0 = scmp.ne.s32.totalorder %s3170_s18, %s2472_s30  ;;  %p2480_p7 = scmp.lt.s32.totalorder %s3170_s18, %s3170_s18 }
  0x53   : > { %p2481_p9 = scmp.lt.s32.totalorder %s2479_s21, %s2472_s30 }
  0x54   : > { %p2475_p2 = pnand %p2473_p0, %p3182_p8 }
  0x55   : > { %p2482_p5 = por %p2481_p9, %p2480_p7 }
  0x56   : > { %p2476_p4 = pneg %p2475_p2 }
  0x58   : > { %p2483_p10 = pnand %p2482_p5, %p2476_p4 }
  0x5a   : > { %2486 = shalt.err (!%p2483_p10)
}
  0x5b   : > { %2238 = dma.hbm_to_vmem [thread:$0]  (!%p3166_p6), %s3823_s3, 16, %s3170_s18, [#allocation10]  }
  0x5c   : > { %s3824_s5 = sld [smem:[#allocation53_spill]] }
  0x62   : > { %s2487_s29 = scalar_lea.hbm %s3824_s5, 16 }
  0x63   : > { %p2488_p11 = scmp.ne.s32.totalorder %s3824_s5, %s2487_s29  ;;  %p2494_p0 = scmp.lt.u32.totalorder %s2487_s29, %s3824_s5 }
  0x65   : > { %p2490_p12 = pnand %p2488_p11, %p3182_p8 }
  0x67   : > { %p2491_p13 = pneg %p2490_p12 }
  0x69   : > { %p2496_p2 = pnand %p2494_p0, %p2491_p13 }
  0x6b   : > { %2499 = shalt.err (!%p2496_p2)
}
  0x6c   : > { %s2500_s21 = scalar_lea.vmem %s486_s20, 16  ;;  %s2507_s18 = scalar_lea.vmem %s486_s20, 32 }
  0x6d   : > { %p2501_p4 = scmp.ne.s32.totalorder %s486_s20, %s2500_s21  ;;  %p2508_p5 = scmp.lt.s32.totalorder %s486_s20, %s486_s20 }
  0x6e   : > { %p2509_p10 = scmp.lt.s32.totalorder %s2507_s18, %s2500_s21 }
  0x6f   : > { %p2503_p7 = pnand %p2501_p4, %p3182_p8 }
  0x70   : > { %p2510_p1 = por %p2509_p10, %p2508_p5 }
  0x71   : > { %p2504_p9 = pneg %p2503_p7 }
  0x73   : > { %p2511_p3 = pnand %p2510_p1, %p2504_p9 }
  0x75   : > { %2514 = shalt.err (!%p2511_p3)
}
  0x76   : > { %2244 = dma.hbm_to_vmem [thread:$0]  (!%p3166_p6), %s3824_s5, 16, %s486_s20, [#allocation13]  }
  0x77   : > { %s3008_s25 = smov [#allocation15]   ;;  %s3009_s29 = smov [#allocation18]  }
  0x78   : > { %s509_s28 = sshll.u32 %s3008_s25, 4  ;;  %s531_s17 = sshll.u32 %s3009_s29, 4  ;;  %s510_s28 = int_to_ptr.vmem [resolvable:$true] %s509_s28  ;;  %s532_s17 = int_to_ptr.vmem [resolvable:$true] %s531_s17 }
  0x79   : > { %s3825_s7 = sld [smem:[#allocation55_spill]] }
  0x7f   : > { %s2515_s30 = scalar_lea.hbm %s3825_s7, 16 }
  0x80   : > { %p2516_p1 = scmp.ne.s32.totalorder %s3825_s7, %s2515_s30  ;;  %p2522_p12 = scmp.lt.u32.totalorder %s2515_s30, %s3825_s7 }
  0x82   : > { %p2518_p3 = pnand %p2516_p1, %p3182_p8 }
  0x84   : > { %p2519_p11 = pneg %p2518_p3 }
  0x86   : > { %p2524_p13 = pnand %p2522_p12, %p2519_p11 }
  0x88   : > { %2527 = shalt.err (!%p2524_p13)
}
  0x89   : > { %s2528_s20 = scalar_lea.vmem %s510_s28, 16  ;;  %s2535_s23 = scalar_lea.vmem %s510_s28, 32 }
  0x8a   : > { %p2529_p0 = scmp.ne.s32.totalorder %s510_s28, %s2528_s20  ;;  %p2536_p7 = scmp.lt.s32.totalorder %s510_s28, %s510_s28 }
  0x8b   : > { %p2537_p9 = scmp.lt.s32.totalorder %s2535_s23, %s2528_s20 }
  0x8c   : > { %p2531_p2 = pnand %p2529_p0, %p3182_p8 }
  0x8d   : > { %p2538_p5 = por %p2537_p9, %p2536_p7 }
  0x8e   : > { %p2532_p4 = pneg %p2531_p2 }
  0x90   : > { %p2539_p10 = pnand %p2538_p5, %p2532_p4 }
  0x92   : > { %2542 = shalt.err (!%p2539_p10)
}
  0x93   : > { %2250 = dma.hbm_to_vmem [thread:$0]  (!%p3166_p6), %s3825_s7, 16, %s510_s28, [#allocation16]  }
  0x94   : > { %s2543_s1 = scalar_lea.hbm %s3778_s9, 16 }
  0x95   : > { %p2544_p1 = scmp.ne.s32.totalorder %s3778_s9, %s2543_s1  ;;  %p2550_p12 = scmp.lt.u32.totalorder %s2543_s1, %s3778_s9 }
  0x97   : > { %p2546_p3 = pnand %p2544_p1, %p3182_p8 }
  0x99   : > { %p2547_p11 = pneg %p2546_p3 }
  0x9b   : > { %p2552_p13 = pnand %p2550_p12, %p2547_p11 }
  0x9d   : > { %2555 = shalt.err (!%p2552_p13)
}
  0x9e   : > { %s2556_s20 = scalar_lea.vmem %s532_s17, 16  ;;  %s2563_s28 = scalar_lea.vmem %s532_s17, 32 }
  0x9f   : > { %p2557_p0 = scmp.ne.s32.totalorder %s532_s17, %s2556_s20  ;;  %p2564_p7 = scmp.lt.s32.totalorder %s532_s17, %s532_s17 }
  0xa0   : > { %p2565_p9 = scmp.lt.s32.totalorder %s2563_s28, %s2556_s20 }
  0xa1   : > { %p2559_p2 = pnand %p2557_p0, %p3182_p8 }
  0xa2   : > { %p2566_p5 = por %p2565_p9, %p2564_p7 }
  0xa3   : > { %p2560_p4 = pneg %p2559_p2 }
  0xa5   : > { %p2567_p10 = pnand %p2566_p5, %p2560_p4 }
  0xa7   : > { %2570 = shalt.err (!%p2567_p10)
}
  0xa8   : > { %2256 = dma.hbm_to_vmem [thread:$0]  (!%p3166_p6), %s3778_s9, 16, %s532_s17, [#allocation19]  }
  0xa9   : > { %s3010_s29 = smov [#allocation21]   ;;  %s3011_s19 = smov [#allocation24]  }
  0xaa   : > { %s555_s16 = sshll.u32 %s3010_s29, 4  ;;  %s579_s1 = sshll.u32 %s3011_s19, 4  ;;  %s556_s16 = int_to_ptr.vmem [resolvable:$true] %s555_s16  ;;  %s580_s1 = int_to_ptr.vmem [resolvable:$true] %s579_s1 }
  0xab   : > { %s2571_s18 = scalar_lea.hbm %s3780_s11, 16 }
  0xac   : > { %p2572_p1 = scmp.ne.s32.totalorder %s3780_s11, %s2571_s18  ;;  %p2578_p12 = scmp.lt.u32.totalorder %s2571_s18, %s3780_s11 }
  0xae   : > { %p2574_p3 = pnand %p2572_p1, %p3182_p8 }
  0xb0   : > { %p2575_p11 = pneg %p2574_p3 }
  0xb2   : > { %p2580_p13 = pnand %p2578_p12, %p2575_p11 }
  0xb4   : > { %2583 = shalt.err (!%p2580_p13)
}
  0xb5   : > { %s2584_s17 = scalar_lea.vmem %s556_s16, 16  ;;  %s2591_s25 = scalar_lea.vmem %s556_s16, 32 }
  0xb6   : > { %p2585_p0 = scmp.ne.s32.totalorder %s556_s16, %s2584_s17  ;;  %p2592_p7 = scmp.lt.s32.totalorder %s556_s16, %s556_s16 }
  0xb7   : > { %p2593_p9 = scmp.lt.s32.totalorder %s2591_s25, %s2584_s17 }
  0xb8   : > { %p2587_p2 = pnand %p2585_p0, %p3182_p8 }
  0xb9   : > { %p2594_p5 = por %p2593_p9, %p2592_p7 }
  0xba   : > { %p2588_p4 = pneg %p2587_p2 }
  0xbc   : > { %p2595_p10 = pnand %p2594_p5, %p2588_p4 }
  0xbe   : > { %2598 = shalt.err (!%p2595_p10)
}
  0xbf   : > { %2262 = dma.hbm_to_vmem [thread:$0]  (!%p3166_p6), %s3780_s11, 16, %s556_s16, [#allocation22]  }
  0xc0   : > { %s2599_s18 = scalar_lea.hbm %s3782_s13, 16 }
  0xc1   : > { %p2600_p1 = scmp.ne.s32.totalorder %s3782_s13, %s2599_s18  ;;  %p2606_p12 = scmp.lt.u32.totalorder %s2599_s18, %s3782_s13 }
  0xc3   : > { %p2602_p3 = pnand %p2600_p1, %p3182_p8 }
  0xc5   : > { %p2603_p11 = pneg %p2602_p3 }
  0xc7   : > { %p2608_p13 = pnand %p2606_p12, %p2603_p11 }
  0xc9   : > { %2611 = shalt.err (!%p2608_p13)
}
  0xca   : > { %s2612_s17 = scalar_lea.vmem %s580_s1, 16  ;;  %s2619_s16 = scalar_lea.vmem %s580_s1, 32 }
  0xcb   : > { %p2613_p0 = scmp.ne.s32.totalorder %s580_s1, %s2612_s17  ;;  %p2620_p7 = scmp.lt.s32.totalorder %s580_s1, %s580_s1 }
  0xcc   : > { %p2621_p9 = scmp.lt.s32.totalorder %s2619_s16, %s2612_s17 }
  0xcd   : > { %p2615_p2 = pnand %p2613_p0, %p3182_p8 }
  0xce   : > { %p2622_p5 = por %p2621_p9, %p2620_p7 }
  0xcf   : > { %p2616_p4 = pneg %p2615_p2 }
  0xd1   : > { %p2623_p10 = pnand %p2622_p5, %p2616_p4 }
  0xd3   : > { %2626 = shalt.err (!%p2623_p10)
}
  0xd4   : > { %2268 = dma.hbm_to_vmem [thread:$0]  (!%p3166_p6), %s3782_s13, 16, %s580_s1, [#allocation25]  }
  0xd5   : > { %s3012_s19 = smov [#allocation11]   ;;  %s3013_s21 = smov [#allocation14]  }
  0xd6   : > { %s471_s30 = sshll.u32 %s3012_s19, 4  ;;  %s495_s18 = sshll.u32 %s3013_s21, 4  ;;  %s472_s30 = int_to_ptr.vmem [resolvable:$true] %s471_s30  ;;  %s496_s18 = int_to_ptr.vmem [resolvable:$true] %s495_s18 }
  0xd7   : > { %s3826_s4 = sld [smem:[#allocation52_spill]] }
  0xdd   : > { %s2627_s28 = scalar_lea.hbm %s3826_s4, 256 }
  0xde   : > { %p2628_p1 = scmp.ne.s32.totalorder %s3826_s4, %s2627_s28  ;;  %p2634_p12 = scmp.lt.u32.totalorder %s2627_s28, %s3826_s4 }
  0xe0   : > { %p2630_p3 = pnand %p2628_p1, %p3182_p8 }
  0xe2   : > { %p2631_p11 = pneg %p2630_p3 }
  0xe4   : > { %p2636_p13 = pnand %p2634_p12, %p2631_p11 }
  0xe6   : > { %2639 = shalt.err (!%p2636_p13)
}
  0xe7   : > { %s2640_s1 = scalar_lea.vmem %s472_s30, 256  ;;  %p2648_p7 = scmp.lt.s32.totalorder %s472_s30, %s472_s30 }
  0xe8   : > { %p2641_p0 = scmp.ne.s32.totalorder %s472_s30, %s2640_s1  ;;  %p2649_p9 = scmp.lt.s32.totalorder %s2640_s1, %s2640_s1 }
  0xea   : > { %p2643_p2 = pnand %p2641_p0, %p3182_p8  ;;  %p2650_p5 = por %p2649_p9, %p2648_p7 }
  0xec   : > { %p2644_p4 = pneg %p2643_p2 }
  0xee   : > { %p2651_p10 = pnand %p2650_p5, %p2644_p4 }
  0xf0   : > { %2654 = shalt.err (!%p2651_p10)
}
  0xf1   : > { %s3827_s29 = smov 64   ;;  %s3828_s6 = sld [smem:[#allocation54_spill]] }
  0xf2   : > { %2241 = dma.hbm_to_vmem [thread:$0]  (!%p3166_p6), %s3826_s4, 256, %s472_s30, [#allocation10], %s3827_s29, %s3827_s29, %s3007_s24  }
  0xf7   : > { %s2655_s28 = scalar_lea.hbm %s3828_s6, 256 }
  0xf8   : > { %p2656_p1 = scmp.ne.s32.totalorder %s3828_s6, %s2655_s28  ;;  %p2662_p12 = scmp.lt.u32.totalorder %s2655_s28, %s3828_s6 }
  0xfa   : > { %p2658_p3 = pnand %p2656_p1, %p3182_p8 }
  0xfc   : > { %p2659_p11 = pneg %p2658_p3 }
  0xfe   : > { %p2664_p13 = pnand %p2662_p12, %p2659_p11 }
 0x100   : > { %2667 = shalt.err (!%p2664_p13)
}
 0x101   : > { %s2668_s1 = scalar_lea.vmem %s496_s18, 256  ;;  %p2676_p7 = scmp.lt.s32.totalorder %s496_s18, %s496_s18 }
 0x102   : > { %p2669_p0 = scmp.ne.s32.totalorder %s496_s18, %s2668_s1  ;;  %p2677_p9 = scmp.lt.s32.totalorder %s2668_s1, %s2668_s1 }
 0x104   : > { %p2671_p2 = pnand %p2669_p0, %p3182_p8  ;;  %p2678_p5 = por %p2677_p9, %p2676_p7 }
 0x106   : > { %p2672_p4 = pneg %p2671_p2 }
 0x108   : > { %p2679_p10 = pnand %p2678_p5, %p2672_p4 }
 0x10a   : > { %2682 = shalt.err (!%p2679_p10)
}
 0x10b   : > { %2247 = dma.hbm_to_vmem [thread:$0]  (!%p3166_p6), %s3828_s6, 256, %s496_s18, [#allocation13], %s3827_s29, %s3827_s29, %s3007_s24  }
 0x10c   : > { %s3014_s21 = smov [#allocation17]   ;;  %s3015_s20 = smov [#allocation20]  }
 0x10d   : > { %s520_s22 = sshll.u32 %s3014_s21, 4  ;;  %s541_s28 = sshll.u32 %s3015_s20, 4  ;;  %s521_s22 = int_to_ptr.vmem [resolvable:$true] %s520_s22  ;;  %s542_s28 = int_to_ptr.vmem [resolvable:$true] %s541_s28 }
 0x10e   : > { %s3829_s8 = sld [smem:[#allocation56_spill]] }
 0x114   : > { %s2683_s16 = scalar_lea.hbm %s3829_s8, 16 }
 0x115   : > { %p2684_p1 = scmp.ne.s32.totalorder %s3829_s8, %s2683_s16  ;;  %p2690_p12 = scmp.lt.u32.totalorder %s2683_s16, %s3829_s8 }
 0x117   : > { %p2686_p3 = pnand %p2684_p1, %p3182_p8 }
 0x119   : > { %p2687_p11 = pneg %p2686_p3 }
 0x11b   : > { %p2692_p13 = pnand %p2690_p12, %p2687_p11 }
 0x11d   : > { %2695 = shalt.err (!%p2692_p13)
}
 0x11e   : > { %s2696_s18 = scalar_lea.vmem %s521_s22, 16  ;;  %s2703_s19 = scalar_lea.vmem %s521_s22, 32 }
 0x11f   : > { %p2697_p0 = scmp.ne.s32.totalorder %s521_s22, %s2696_s18  ;;  %p2704_p7 = scmp.lt.s32.totalorder %s521_s22, %s521_s22 }
 0x120   : > { %p2705_p9 = scmp.lt.s32.totalorder %s2703_s19, %s2696_s18 }
 0x121   : > { %p2699_p2 = pnand %p2697_p0, %p3182_p8 }
 0x122   : > { %p2706_p5 = por %p2705_p9, %p2704_p7 }
 0x123   : > { %p2700_p4 = pneg %p2699_p2 }
 0x125   : > { %p2707_p10 = pnand %p2706_p5, %p2700_p4 }
 0x127   : > { %2710 = shalt.err (!%p2707_p10)
}
 0x128   : > { %2253 = dma.hbm_to_vmem [thread:$0]  (!%p3166_p6), %s3829_s8, 16, %s521_s22, [#allocation16]  }
 0x129   : > { %s2711_s17 = scalar_lea.hbm %s3779_s10, 256 }
 0x12a   : > { %p2712_p1 = scmp.ne.s32.totalorder %s3779_s10, %s2711_s17  ;;  %p2718_p12 = scmp.lt.u32.totalorder %s2711_s17, %s3779_s10 }
 0x12c   : > { %p2714_p3 = pnand %p2712_p1, %p3182_p8 }
 0x12e   : > { %p2715_p11 = pneg %p2714_p3 }
 0x130   : > { %p2720_p13 = pnand %p2718_p12, %p2715_p11 }
 0x132   : > { %2723 = shalt.err (!%p2720_p13)
}
 0x133   : > { %s2724_s18 = scalar_lea.vmem %s542_s28, 256  ;;  %p2732_p7 = scmp.lt.s32.totalorder %s542_s28, %s542_s28 }
 0x134   : > { %p2725_p0 = scmp.ne.s32.totalorder %s542_s28, %s2724_s18  ;;  %p2733_p9 = scmp.lt.s32.totalorder %s2724_s18, %s2724_s18 }
 0x136   : > { %p2727_p2 = pnand %p2725_p0, %p3182_p8  ;;  %p2734_p5 = por %p2733_p9, %p2732_p7 }
 0x138   : > { %p2728_p4 = pneg %p2727_p2 }
 0x13a   : > { %p2735_p10 = pnand %p2734_p5, %p2728_p4 }
 0x13c   : > { %2738 = shalt.err (!%p2735_p10)
}
 0x13d   : > { %2259 = dma.hbm_to_vmem [thread:$0]  (!%p3166_p6), %s3779_s10, 256, %s542_s28, [#allocation19], %s3827_s29, %s3827_s29, %s3007_s24  }
 0x13e   : > { %s3016_s21 = smov [#allocation23]   ;;  %s3017_s2 = smov [#allocation26]  }
 0x13f   : > { %s565_s20 = sshll.u32 %s3016_s21, 4  ;;  %s590_s23 = sshll.u32 %s3017_s2, 4  ;;  %s566_s20 = int_to_ptr.vmem [resolvable:$true] %s565_s20  ;;  %s591_s23 = int_to_ptr.vmem [resolvable:$true] %s590_s23 }
 0x140   : > { %s2739_s25 = scalar_lea.hbm %s3781_s12, 1024 }
 0x141   : > { %p2740_p1 = scmp.ne.s32.totalorder %s3781_s12, %s2739_s25  ;;  %p2746_p12 = scmp.lt.u32.totalorder %s2739_s25, %s3781_s12 }
 0x143   : > { %p2742_p3 = pnand %p2740_p1, %p3182_p8 }
 0x145   : > { %p2743_p11 = pneg %p2742_p3 }
 0x147   : > { %p2748_p13 = pnand %p2746_p12, %p2743_p11 }
 0x149   : > { %2751 = shalt.err (!%p2748_p13)
}
 0x14a   : > { %s2752_s28 = scalar_lea.vmem %s566_s20, 1024  ;;  %p2760_p7 = scmp.lt.s32.totalorder %s566_s20, %s566_s20 }
 0x14b   : > { %p2753_p0 = scmp.ne.s32.totalorder %s566_s20, %s2752_s28  ;;  %p2761_p9 = scmp.lt.s32.totalorder %s2752_s28, %s2752_s28 }
 0x14d   : > { %p2755_p2 = pnand %p2753_p0, %p3182_p8  ;;  %p2762_p5 = por %p2761_p9, %p2760_p7 }
 0x14f   : > { %p2756_p4 = pneg %p2755_p2 }
 0x151   : > { %p2763_p10 = pnand %p2762_p5, %p2756_p4 }
 0x153   : > { %2766 = shalt.err (!%p2763_p10)
}
 0x154   : > { %2265 = dma.hbm_to_vmem [thread:$0]  (!%p3166_p6), %s3781_s12, 1024, %s566_s20, [#allocation22], %s3827_s29, %s3827_s29, %s3007_s24  }
 0x155   : > { %s2767_s16 = scalar_lea.hbm %s3783_s14, 16 }
 0x156   : > { %p2768_p1 = scmp.ne.s32.totalorder %s3783_s14, %s2767_s16  ;;  %p2774_p12 = scmp.lt.u32.totalorder %s2767_s16, %s3783_s14 }
 0x158   : > { %p2770_p3 = pnand %p2768_p1, %p3182_p8 }
 0x15a   : > { %p2771_p11 = pneg %p2770_p3 }
 0x15c   : > { %p2776_p13 = pnand %p2774_p12, %p2771_p11 }
 0x15e   : > { %2779 = shalt.err (!%p2776_p13)
}
 0x15f   : > { %s2780_s22 = scalar_lea.vmem %s591_s23, 16  ;;  %s2787_s24 = scalar_lea.vmem %s591_s23, 32 }
 0x160   : > { %p2781_p0 = scmp.ne.s32.totalorder %s591_s23, %s2780_s22  ;;  %p2788_p7 = scmp.lt.s32.totalorder %s591_s23, %s591_s23 }
 0x161   : > { %p2789_p9 = scmp.lt.s32.totalorder %s2787_s24, %s2780_s22 }
 0x162   : > { %p2783_p2 = pnand %p2781_p0, %p3182_p8 }
 0x163   : > { %p2790_p5 = por %p2789_p9, %p2788_p7 }
 0x164   : > { %p2784_p4 = pneg %p2783_p2 }
 0x166   : > { %p2791_p10 = pnand %p2790_p5, %p2784_p4 }
 0x168   : > { %2794 = shalt.err (!%p2791_p10)
}
 0x169   : > { %2271 = dma.hbm_to_vmem [thread:$0]  (!%p3166_p6), %s3783_s14, 16, %s591_s23, [#allocation25]  }
 0x16a   : > { %s3018_s28 = smov [#allocation27]   ;;  %s2795_s17 = scalar_lea.hbm %s3784_s15, 16 }
 0x16b   : > { %s601_s19 = sshll.u32 %s3018_s28, 4  ;;  %p2796_p1 = scmp.ne.s32.totalorder %s3784_s15, %s2795_s17  ;;  %s602_s19 = int_to_ptr.vmem [resolvable:$true] %s601_s19 }
 0x16c   : > { %p2802_p12 = scmp.lt.u32.totalorder %s2795_s17, %s3784_s15 }
 0x16d   : > { %p2798_p3 = pnand %p2796_p1, %p3182_p8 }
 0x16f   : > { %p2799_p11 = pneg %p2798_p3 }
 0x171   : > { %p2804_p13 = pnand %p2802_p12, %p2799_p11 }
 0x173   : > { %2807 = shalt.err (!%p2804_p13)
}
 0x174   : > { %s2808_s23 = scalar_lea.vmem %s602_s19, 16  ;;  %s2815_s18 = scalar_lea.vmem %s602_s19, 32 }
 0x175   : > { %p2809_p0 = scmp.ne.s32.totalorder %s602_s19, %s2808_s23  ;;  %p2816_p7 = scmp.lt.s32.totalorder %s602_s19, %s602_s19 }
 0x176   : > { %p2817_p9 = scmp.lt.s32.totalorder %s2815_s18, %s2808_s23 }
 0x177   : > { %p2811_p2 = pnand %p2809_p0, %p3182_p8 }
 0x178   : > { %p2818_p5 = por %p2817_p9, %p2816_p7 }
 0x179   : > { %p2812_p4 = pneg %p2811_p2 }
 0x17b   : > { %p2819_p10 = pnand %p2818_p5, %p2812_p4 }
 0x17d   : > { %2822 = shalt.err (!%p2819_p10)
}
 0x17e   : > { %s3830_s29 = sld [smem:[#allocation45_spill]]  ;;  %s3831_s20 = sld [smem:[#allocation43_spill]] }
 0x17f   : > { %s3832_s28 = sld [smem:[#allocation42_spill]]  ;;  %s3833_s27 = sld [smem:[#allocation41_spill]] }
 0x180   : > { %s3834_s21 = sld [smem:[#allocation46_spill]]  ;;  %s1952_s2 = sadd.s32 4294967294, %s3001_s26  }
 0x181   : > { %2274 = dma.hbm_to_vmem [thread:$0]  (!%p3166_p6), %s3784_s15, 16, %s602_s19, [#allocation28]  }
 0x182   : > { %p71_p3 = scmp.eq.s32.totalorder %s3001_s26, 0  ;;  %p428_p7 = scmp.eq.s32.totalorder %s1952_s2, 1 }
 0x183   : > { %p2300_p5 = scmp.lt.s32.totalorder %s3001_s26, 2 }
 0x184   : > { %s54_s17 = sadd.s32 1, %s3830_s29  ;;  %s63_s0 = sadd.s32 1, %s3831_s20 }
 0x185   : > { %p56_p8 = scmp.ge.s32.totalorder %s54_s17, 2  ;;  %p70_p1 = scmp.ne.s32.totalorder %s3831_s20, %s3832_s28 }
 0x186   : > { %p76_p12 = scmp.ne.s32.totalorder %s3832_s28, %s3833_s27  ;;  %p422_p6 = scmp.eq.s32.totalorder %s3834_s21, 1 }
 0x187   : > { %s3877_s17 = smov (%p56_p8, %s54_s17), 0  ;;  %p3467_p11 = por %p71_p3, %p70_p1 }
 0x188   : > { %s58_s19 = ssub.s32 %s3830_s29, %s3877_s17  ;;  %p3836_p0 = scmp.eq.s32.totalorder %s3834_s21, 0 }
 0x189   : > { %p61_p13 = scmp.eq.s32.totalorder %s58_s19, 0  ;;  %p3482_p4 = por %p422_p6, %p70_p1 }
 0x18a   : > { %p3478_p2 = por %p3836_p0, %p76_p12  ;;  %p3489_p9 = por %p428_p7, %p76_p12 }
 0x18b   : > { %s3838_s1 = scalar_select %p3482_p4, 1, 0 }
 0x18c   : > { %s3837_s25 = scalar_select %p3478_p2, 1, 0 }
 0x18d   : > { %s3487_s30 = scalar_select %p61_p13, %s3831_s20, %s63_s0  }
 0x18e   : > { %s3839_s23 = scalar_select %p3489_p9, 1, 0 }
 0x18f   : > { %s612_s18 = sand.u32 1, %s3831_s20   ;;  %s1970_s22 = sshll.u32 %s3830_s29, 7 }
 0x190   : > { %s3496_s24 = sshll.u32 %s612_s18, 3  ;;  %s3840_s21 = sld [smem:[#allocation48_spill]] }
 0x191   : > { %s616_s2 = scalar_lea.vmem [#allocation3], %s3496_s24  ;;  %p3506_p10 = pnand %p2300_p5, %p3467_p11 }
 0x192   : > { %s624_s0 = sshll.u32 %s616_s2, 4  ;;  %s3843_s28 = sld [smem:[#allocation49_spill]]  ;;  %s3510_s0 = int_to_ptr.vmem [resolvable:$true] %s624_s0 }
 0x193   : > { %p2825_p1 = pneg %p3506_p10 }
 0x196   : > { %s3841_s19 = smov %s3840_s21  ;;  %s3501_s3 = scalar_lea.hbm %s3840_s21, %s1970_s22 }
 0x197   : > { %s613_s21 = scalar_lea.sflag [#allocation4], %s612_s18  ;;  %s2823_s5 = scalar_lea.hbm %s3501_s3, 128 }
 0x198   : > { %s3515_s27 = scalar_lea.hbm %s3843_s28, %s1970_s22  ;;  %p2824_p8 = scmp.ne.s32.totalorder %s3501_s3, %s2823_s5 }
 0x199   : > { %s2828_s6 = scalar_lea.hbm %s3841_s19, 256  ;;  %p2829_p12 = scmp.lt.u32.totalorder %s3501_s3, %s3841_s19 }
 0x19a   : > { %p2826_p3 = pnand %p2825_p1, %p2824_p8  ;;  %p2830_p6 = scmp.lt.u32.totalorder %s2828_s6, %s2823_s5 }
 0x19b   : > { %p2832_p0 = scmp.lt.u32.totalorder %s2823_s5, %s3501_s3 }
 0x19c   : > { %p2827_p11 = pneg %p2826_p3  ;;  %p2831_p13 = por %p2830_p6, %p2829_p12 }
 0x19e   : > { %p2833_p7 = por %p2832_p0, %p2831_p13 }
 0x1a0   : > { %p2834_p5 = pnand %p2833_p7, %p2827_p11 }
 0x1a2   : > { %2837 = shalt.err (!%p2834_p5)
}
 0x1a3   : > { %s2838_s18 = scalar_lea.vmem %s3510_s0, 128  ;;  %s3019_s22 = smov [#allocation3]  }
 0x1a4   : > { %p2839_p8 = scmp.ne.s32.totalorder %s3510_s0, %s2838_s18  ;;  %s2843_s29 = sshll.u32 %s3019_s22, 4  ;;  %s2844_s29 = int_to_ptr.vmem [resolvable:$false] %s2843_s29 }
 0x1a5   : > { %s2845_s7 = scalar_lea.vmem %s2844_s29, 256  ;;  %p2846_p4 = scmp.lt.s32.totalorder %s3510_s0, %s2844_s29 }
 0x1a6   : > { %p2841_p3 = pnand %p2839_p8, %p2825_p1  ;;  %p2847_p12 = scmp.lt.s32.totalorder %s2845_s7, %s2838_s18 }
 0x1a8   : > { %p2842_p9 = pneg %p2841_p3  ;;  %p2848_p6 = por %p2847_p12, %p2846_p4 }
 0x1aa   : > { %p2849_p13 = pnand %p2848_p6, %p2842_p9 }
 0x1ac   : > { %2852 = shalt.err (!%p2849_p13)
}
 0x1ad   : > { %2278 = dma.hbm_to_vmem [thread:$0]  (!%p3506_p10), %s3501_s3, 128, %s3510_s0, %s613_s21  }
 0x1ae   : > { %s631_s5 = sand.u32 1, %s3001_s26   ;;  %s635_s6 = scalar_lea.vmem [#allocation6], %s3496_s24 }
 0x1af   : > { %s642_s8 = sshll.u32 %s635_s6, 4  ;;  %s632_s20 = scalar_lea.sflag [#allocation7], %s631_s5  ;;  %s643_s8 = int_to_ptr.vmem [resolvable:$true] %s642_s8 }
 0x1b0   : > { %s2853_s16 = scalar_lea.hbm %s3515_s27, 128  ;;  %s2858_s22 = scalar_lea.hbm %s3843_s28, 256 }
 0x1b1   : > { %p2854_p4 = scmp.ne.s32.totalorder %s3515_s27, %s2853_s16  ;;  %p2859_p0 = scmp.lt.u32.totalorder %s3515_s27, %s3843_s28 }
 0x1b2   : > { %p2860_p7 = scmp.lt.u32.totalorder %s2858_s22, %s2853_s16  ;;  %p2862_p8 = scmp.lt.u32.totalorder %s2853_s16, %s3515_s27 }
 0x1b3   : > { %p2856_p9 = pnand %p2854_p4, %p2825_p1 }
 0x1b4   : > { %p2861_p5 = por %p2860_p7, %p2859_p0 }
 0x1b5   : > { %p2857_p11 = pneg %p2856_p9 }
 0x1b6   : > { %p2863_p3 = por %p2862_p8, %p2861_p5 }
 0x1b8   : > { %p2864_p12 = pnand %p2863_p3, %p2857_p11 }
 0x1ba   : > { %2867 = shalt.err (!%p2864_p12)
}
 0x1bb   : > { %s2868_s3 = scalar_lea.vmem %s643_s8, 128  ;;  %s3020_s24 = smov [#allocation6]  }
 0x1bc   : > { %p2869_p6 = scmp.ne.s32.totalorder %s643_s8, %s2868_s3  ;;  %s2873_s0 = sshll.u32 %s3020_s24, 4  ;;  %s2874_s0 = int_to_ptr.vmem [resolvable:$false] %s2873_s0 }
 0x1bd   : > { %s2875_s21 = scalar_lea.vmem %s2874_s0, 256  ;;  %p2876_p9 = scmp.lt.s32.totalorder %s643_s8, %s2874_s0 }
 0x1be   : > { %p2871_p13 = pnand %p2869_p6, %p2825_p1  ;;  %p2877_p2 = scmp.lt.s32.totalorder %s2875_s21, %s2868_s3 }
 0x1c0   : > { %p2872_p4 = pneg %p2871_p13  ;;  %p2878_p0 = por %p2877_p2, %p2876_p9 }
 0x1c2   : > { %p2879_p7 = pnand %p2878_p0, %p2872_p4 }
 0x1c4   : > { %2882 = shalt.err (!%p2879_p7)
}
 0x1c5   : > { %2281 = dma.hbm_to_vmem [thread:$0]  (!%p3506_p10), %s3515_s27, 128, %s643_s8, %s632_s20  }
 0x1c6   : > { %s3844_s5 = sld [smem:[#allocation47_spill]] }
 0x1cc   : > { %p3845_p11 = scmp.ne.s32.totalorder %s3844_s5, 0 }
 0x1cd   : > { %s3846_s6 = sld [smem:[#allocation42_spill]] (!%p3845_p11)  ;;  %p3847_p2 = scmp.ne.s32.totalorder (!%p3845_p11), %s3837_s25, 0 }
 0x1ce   : > { %651 = sbr.rel (%p3845_p11) target bundleno = 3062 (0xbf6), region = 84 }
 0x1d3   : > { %s3566_s16 = sand.u32 (!%p3845_p11), 1, %s3846_s6  }
 0x1d4   : > { %s3569_s2 = sshll.u32 (!%p3845_p11), %s3566_s16, 3  ;;  %s654_s18 = scalar_lea.sflag (!%p3845_p11), [#allocation4], %s3566_s16 }
 0x1d5   : > { %s657_s22 = scalar_lea.vmem [#allocation3], %s3569_s2 }
 0x1d6   : > { %2936 = dma.done.wait (%p3847_p2), %s654_s18, 128  }
 0x1d7   : > { %2938 = vsyncadd (%p3847_p2), %s654_s18, 4294967168  ;;  %s3848_s4 = sld [smem:[#allocation46_spill]]  ;;  %s666_s20 = scalar_lea.vmem [#allocation6], %s3569_s2 }
 0x1dd   : > { %s662_s27 = sand.u32 1, %s3848_s4  }
 0x1de   : > { %s663_s8 = scalar_lea.sflag [#allocation7], %s662_s27 }
 0x1df   : > { %2940 = dma.done.wait (%p3847_p2), %s663_s8, 128  }
 0x1e0   : > { %2942 = vsyncadd (%p3847_p2), %s663_s8, 4294967168  ;;  %p3849_p10 = scmp.eq.s32.totalorder %s3848_s4, 0 }
 0x1e2   : > { %2944 = dma.done.wait (%p3849_p10), [#allocation7], 256   ;;  %p3850_p1 = pmov %p3849_p10 }
 0x1e4   : > { %2946 = vsyncadd (%p3850_p1), [#allocation7], 4294967040  ;;  %p3851_p5 = pmov %p3850_p1 }
 0x1e5   : > { %p3852_p8 = pmov %p3850_p1 }
 0x1e6   : > { %2948 = dma.done.wait (%p3851_p5), [#allocation10], 272  }
 0x1e7   : > { %2950 = vsyncadd (%p3852_p8), [#allocation10], 4294967024  ;;  %p3853_p3 = pmov %p3850_p1 }
 0x1e8   : > { %p3854_p12 = pmov %p3850_p1 }
 0x1e9   : > { %2952 = dma.done.wait (%p3853_p3), [#allocation13], 272  }
 0x1ea   : > { %2954 = vsyncadd (%p3854_p12), [#allocation13], 4294967024  ;;  %p3855_p6 = pmov %p3850_p1 }
 0x1eb   : > { %p3856_p13 = pmov %p3850_p1 }
 0x1ec   : > { %2956 = dma.done.wait (%p3855_p6), [#allocation16], 32  }
 0x1ed   : > { %2958 = vsyncadd (%p3856_p13), [#allocation16], 4294967264  ;;  %p3857_p4 = pmov %p3850_p1 }
 0x1ee   : > { %p3858_p9 = pmov %p3850_p1 }
 0x1ef   : > { %2960 = dma.done.wait (%p3857_p4), [#allocation19], 272  }
 0x1f0   : > { %2962 = vsyncadd (%p3858_p9), [#allocation19], 4294967024  ;;  %p3859_p0 = pmov %p3850_p1 }
 0x1f2   : > { %2964 = dma.done.wait (%p3859_p0), [#allocation22], 1040   ;;  %p3860_p7 = pmov %p3859_p0 }
 0x1f3   : > { %p3861_p11 = pmov %p3859_p0 }
 0x1f4   : > { %2966 = vsyncadd (%p3860_p7), [#allocation22], 4294966256 }
 0x1f5   : > { %2968 = dma.done.wait (%p3861_p11), [#allocation25], 32   ;;  %p3862_p2 = pmov %p3859_p0 }
 0x1f6   : > { %p3863_p10 = pmov %p3859_p0 }
 0x1f7   : > { %2970 = vsyncadd (%p3862_p2), [#allocation25], 4294967264 }
 0x1f8   : > { %2972 = dma.done.wait (%p3863_p10), [#allocation28], 16   ;;  %p3864_p1 = pmov %p3859_p0 }
 0x1f9   : > { %v3021_v0 = vmov 0.0   ;;  %vm3022_vm0 = vmmov 0   ;;  %v2392_v1 = vld [vmem:[#allocation11] sm:$0xff]   ;;  %v2393_v2 = vld [vmem:[#allocation11 + $0x8] sm:$0xff]   ;;  %vm806_vm1 = vcmask 261120   ;;  %v2395_v6 = vld [vmem:[#allocation8 + $0x8] sm:$0xff]  }
 0x1fa   : > { %2974 = vsyncadd (%p3864_p1), [#allocation28], 4294967280  ;;  %2070 = vmatprep.subr.bf16.mxu1 %v3021_v0  ;;  %2074 = vmatprep.mubr.msk.bf16.mxu1 %vm3022_vm0, %v3021_v0  ;;  %v781_v3 = vld [vmem:[%s666_s20] sm:$0xff]  ;;  %v2394_v4 = vld [vmem:[#allocation8] sm:$0xff]   ;;  %vm851_vm2 = vcmask 519168   ;;  %vm924_vm3 = vcmask 64512  }
 0x1fb   : > { %2098 = vmatprep.subr.bf16.mxu0 %v3021_v0  ;;  %2100 = vmatprep.mubr.msk.bf16.mxu0 %vm3022_vm0, %v3021_v0  ;;  %v782_v5 = vpack.c.bf16 %v781_v3, %v781_v3  ;;  %v3625_v7 = vld [vmem:[%s657_s22] sm:$0xff]  ;;  %v1995_v16 = vld [vmem:[#allocation9] ss:$0 sm:$0xff]  ;;  %s3023_s25 = smov 112   ;;  %s3024_s29 = smov 120   ;;  %vm991_vm4 = vcmask 1043456  }
 0x1fc   : > { %2071 = vmatpush3.bf16.msra.mxu1 %v2392_v1  ;;  %v854_v8 = vpack.c.bf16 %v3625_v7, %v3625_v7  ;;  %v1991_v9 = vld [vmem:[#allocation12] ss:$0 sm:$0xff]  ;;  %s3025_s7 = smov 104   ;;  %s3026_s3 = smov 96   ;;  %vm1379_vm5 = vcmask 130048   ;;  %vm1381_vm6 = vcmask 195584  }
 0x1fd   : > { %2072 = vmatprep.subr.bf16.mxu1 %v3021_v0  ;;  %s3027_s24 = smov 80   ;;  %s3028_s0 = smov 72  }
 0x1fe   : > { %s3029_s21 = smov 88   ;;  %s3030_s5 = smov 8  }
 0x1ff   : > { %s3031_s6 = smov 16   ;;  %s3032_s18 = smov 24  }
 0x200   : > { %2073 = vmatpush3.bf16.msra.mxu1 %v2393_v2  ;;  %s3865_s22 = sld [smem:[#allocation44_spill]]  ;;  %s775_s27 = scalar_lea.vmem [#allocation29], %s3569_s2 }
 0x201   : > { %2078 = vmatprep.subr.bf16.mxu1 %v3021_v0  ;;  %s1715_s8 = sshll.u32 %s775_s27, 4  ;;  %p3867_p8 = scmp.ne.s32.totalorder %s3838_s1, 0  ;;  %s3721_s8 = int_to_ptr.vmem [resolvable:$true] %s1715_s8 }
 0x202   : > { %s3033_s2 = smov [#allocation29]  }
 0x203   : > { %2075 = vmatmul.mubr.msk.bf16.vlgmr.msra.gmra.mrb[0].mxu1 %vm806_vm1, %v782_v5 }
 0x204   : > { %2079 = vmatpush3.bf16.msra.mxu1 %v2394_v4  ;;  %2082 = vmatprep.mubr.msk.bf16.mxu1 %vm3022_vm0, %v3021_v0 }
 0x205   : > { %2080 = vmatprep.subr.bf16.mxu1 %v3021_v0 }
 0x206   : > { %s2030_s4 = sshll.u32 %s3865_s22, 7 }
 0x208   : > { %2081 = vmatpush3.bf16.msra.mxu1 %v2395_v6 }
 0x209   : > { %2086 = vmatprep.subr.bf16.mxu1 %v3021_v0 }
 0x20b   : > { %2083 = vmatmul.mubr.msk.bf16.vlgmr.msra.gmra.mrb[4].mxu1 %vm806_vm1, %v854_v8 }
 0x20c   : > { %2088 = vmatprep.mubr.msk.bf16.mxu1 %vm3022_vm0, %v3021_v0 }
 0x2d6   : > { %v844_v10 = vpop.f32.mrb[0].mxu1 }
 0x2d7   : > { %v845_v11 = vadd.f32 %v1991_v9, %v844_v10  ;;  %v2076_v12 = vpop.f32.mrb[1].mxu1 }
 0x2d8   : > { %v847_v13 = vpop.f32.mrb[2].mxu1 }
 0x2d9   : > { %v850_v14 = vpack.c.bf16 %v845_v11, %v845_v11  ;;  %v2077_v15 = vpop.f32.mrb[3].mxu1 }
 0x2db   : > { %852 = vst.msk [vmem:[#allocation2] sm:$0xf] %vm851_vm2, %v850_v14 }
 0x2de   : > { %v916_v17 = vpop.f32.mrb[4].mxu1 }
 0x2df   : > { %v2084_v18 = vpop.f32.mrb[5].mxu1  ;;  %v917_v20 = vadd.f32 %v1995_v16, %v916_v17 }
 0x2e0   : > { %v919_v19 = vpop.f32.mrb[6].mxu1 }
 0x2e1   : > { %v2085_v21 = vpop.f32.mrb[7].mxu1  ;;  %v922_v25 = vpack.c.bf16 %v917_v20, %v917_v20 }
 0x2e2   : > { %v923_v22 = vld [vmem:[#allocation2] sm:$0xf] }
 0x2e3   : > { %v929_v23 = vsel %vm924_vm3, %v923_v22, 0  ;;  %v3638_v24 = vcombine.low %v923_v22, %v923_v22 }
 0x2e4   : > { %2087 = vmatpush3.bf16.xpose.msra.mxu1 %v929_v23 }
 0x2e5   : > { %1148 = vrot.lane.b32.xlu1 %v3638_v24, %s3023_s25  ;;  %1038 = vrot.lane.b32.xlu0 %v3638_v24, %s3024_s29 }
 0x2e6   : > { %2092 = vmatprep.subr.bf16.mxu1 %v3021_v0 }
 0x2e9   : > { %1146 = vrot.lane.b32.xlu1 %v922_v25, %s3023_s25  ;;  %1036 = vrot.lane.b32.xlu0 %v922_v25, %s3024_s29  ;;  %s3866_s29 = sld [smem:[#allocation57_spill]] }
 0x2eb   : > { %2089 = vmatmul.mubr.msk.bf16.vlgmr.msra.gmra.mrb[8].mxu1 %vm924_vm3, %v922_v25 }
 0x2ec   : > { %2094 = vmatprep.mubr.msk.bf16.mxu1 %vm3022_vm0, %v3021_v0 }
 0x2ed   : > { %1256 = vrot.lane.b32.xlu1 %v922_v25, %s3025_s7  ;;  %1258 = vrot.lane.b32.xlu0 %v3638_v24, %s3025_s7 }
 0x2ef   : > { %s3719_s7 = scalar_lea.hbm %s3866_s29, %s2030_s4 }
 0x357   : > { %v1039_v26 = vpop.permute.xlu0 %1038  ;;  %v1149_v28 = vpop.permute.xlu1 %1148 }
 0x358   : > { %v1044_v27 = vsel %vm924_vm3, %v1039_v26, 0  ;;  %v1154_v30 = vsel %vm924_vm3, %v1149_v28, 0 }
 0x359   : > { %2099 = vmatpush3.bf16.xpose.msra.mxu0 %v1044_v27 }
 0x35a   : > { %2110 = vmatprep.subr.bf16.mxu0 %v3021_v0 }
 0x35b   : > { %v1037_v29 = vpop.permute.xlu0 %1036  ;;  %v1147_v32 = vpop.permute.xlu1 %1146 }
 0x35f   : > { %v1259_v31 = vpop.permute.xlu0 %1258  ;;  %v1257_v34 = vpop.permute.xlu1 %1256 }
 0x360   : > { %2101 = vmatmul.mubr.msk.bf16.vlgmr.msra.gmra.mrb[0].mxu0 %vm924_vm3, %v1037_v29  ;;  %v1264_v33 = vsel %vm924_vm3, %v1259_v31, 0 }
 0x361   : > { %2111 = vmatpush3.bf16.xpose.msra.mxu0 %v1154_v30  ;;  %2112 = vmatprep.mubr.msk.bf16.mxu0 %vm3022_vm0, %v3021_v0 }
 0x362   : > { %2122 = vmatprep.subr.bf16.mxu0 %v3021_v0 }
 0x368   : > { %2113 = vmatmul.mubr.msk.bf16.vlgmr.msra.gmra.mrb[4].mxu0 %vm924_vm3, %v1147_v32 }
 0x369   : > { %2123 = vmatpush3.bf16.xpose.msra.mxu0 %v1264_v33  ;;  %2124 = vmatprep.mubr.msk.bf16.mxu0 %vm3022_vm0, %v3021_v0 }
 0x36a   : > { %2134 = vmatprep.subr.bf16.mxu0 %v3021_v0 }
 0x370   : > { %2125 = vmatmul.mubr.msk.bf16.vlgmr.msra.gmra.mrb[8].mxu0 %vm924_vm3, %v1257_v34 }
 0x371   : > { %2138 = vmatprep.mubr.msk.bf16.mxu0 %vm3022_vm0, %v3021_v0 }
 0x3be   : > { %v965_v35 = vpop.f32.mrb[8].mxu1 }
 0x3bf   : > { %v2090_v36 = vpop.f32.mrb[9].mxu1  ;;  %v971_v37 = vsel %vm924_vm3, %v965_v35, -inf }
 0x3c0   : > { %972 = vmax.xlane.f32.xlu0 %v971_v37  ;;  %v968_v38 = vpop.f32.mrb[10].mxu1 }
 0x3c1   : > { %v2091_v39 = vpop.f32.mrb[11].mxu1 }
 0x433   : > { %v1080_v40 = vpop.f32.mrb[0].mxu0 }
 0x434   : > { %v2102_v41 = vpop.f32.mrb[1].mxu0  ;;  %v1086_v42 = vsel %vm924_vm3, %v1080_v40, -inf }
 0x435   : > { %1087 = vmax.xlane.f32.xlu1 %v1086_v42  ;;  %v1083_v43 = vpop.f32.mrb[2].mxu0  ;;  %v2397_v41 = vld [vmem:[#allocation14] sm:$0xff]  }
 0x436   : > { %v2103_v44 = vpop.f32.mrb[3].mxu0  ;;  %2135 = vmatpush3.bf16.msra.mxu0 %v2397_v41 }
 0x437   : > { %2136 = vmatprep.subr.bf16.mxu0 %v3021_v0 }
 0x43b   : > { %v1190_v45 = vpop.f32.mrb[4].mxu0 }
 0x43c   : > { %v2114_v46 = vpop.f32.mrb[5].mxu0  ;;  %v1196_v47 = vsel %vm924_vm3, %v1190_v45, -inf }
 0x43d   : > { %v1193_v48 = vpop.f32.mrb[6].mxu0  ;;  %1197 = vmax.xlane.f32.xlu0 %v1196_v47  ;;  %v2398_v46 = vld [vmem:[#allocation14 + $0x8] sm:$0xff]  }
 0x43e   : > { %v2115_v49 = vpop.f32.mrb[7].mxu0  ;;  %2137 = vmatpush3.bf16.msra.mxu0 %v2398_v46 }
 0x43f   : > { %2150 = vmatprep.subr.bf16.mxu0 %v3021_v0 }
 0x443   : > { %v1300_v50 = vpop.f32.mrb[8].mxu0 }
 0x444   : > { %v2126_v51 = vpop.f32.mrb[9].mxu0  ;;  %v1306_v52 = vsel %vm924_vm3, %v1300_v50, -inf }
 0x445   : > { %v1303_v53 = vpop.f32.mrb[10].mxu0  ;;  %1307 = vmax.xlane.f32.xlu0 %v1306_v52 }
 0x446   : > { %v2127_v54 = vpop.f32.mrb[11].mxu0 }
 0x44d   : > { %v973_v55 = vpop.xlane.xlu0 %972 }
 0x44e   : > { %v974_v56 = vsub.f32 %v965_v35, %v973_v55 }
 0x450   : > { %v975_v57 = vmul.f32 1.442695, %v974_v56 }
 0x452   : > { %2409 = vpow2.f32 %v975_v57 }
 0x45c   : > { %v2410_v58 = vpop.eup %2409 }
 0x45d   : > { %v977_v59 = vsel %vm924_vm3, %v2410_v58, 0.0 }
 0x45e   : > { %978 = vadd.xlane.f32.xlu1 %v977_v59 }
 0x46f   : > { %986 = vrot.lane.b32.xlu1 %v3638_v24, %s3026_s3  ;;  %s1701_s3 = scalar_lea.sflag [#allocation5], %s3566_s16 }
 0x4c2   : > { %v1088_v60 = vpop.xlane.xlu1 %1087 }
 0x4c3   : > { %v1089_v61 = vsub.f32 %v1080_v40, %v1088_v60 }
 0x4c5   : > { %v1090_v62 = vmul.f32 1.442695, %v1089_v61 }
 0x4c7   : > { %2411 = vpow2.f32 %v1090_v62  ;;  %v2008_v62 = vld [vmem:[#allocation15] ss:$0 sm:$0xff] }
 0x4ca   : > { %v1198_v63 = vpop.xlane.xlu0 %1197 }
 0x4cb   : > { %v1199_v1 = vsub.f32 %v1190_v45, %v1198_v63 }
 0x4cd   : > { %v1200_v2 = vmul.f32 1.442695, %v1199_v1 }
 0x4cf   : > { %2413 = vpow2.f32 %v1200_v2 }
 0x4d1   : > { %v2412_v3 = vpop.eup %2411 }
 0x4d2   : > { %v1308_v4 = vpop.xlane.xlu0 %1307  ;;  %v1092_v5 = vsel %vm924_vm3, %v2412_v3, 0.0 }
 0x4d3   : > { %v1309_v6 = vsub.f32 %v1300_v50, %v1308_v4  ;;  %1093 = vadd.xlane.f32.xlu0 %v1092_v5 }
 0x4d5   : > { %v1310_v8 = vmul.f32 1.442695, %v1309_v6 }
 0x4d7   : > { %2415 = vpow2.f32 %v1310_v8 }
 0x4d9   : > { %v2414_v9 = vpop.eup %2413 }
 0x4da   : > { %v1202_v10 = vsel %vm924_vm3, %v2414_v9, 0.0 }
 0x4db   : > { %1203 = vadd.xlane.f32.xlu1 %v1202_v10 }
 0x4e1   : > { %v2416_v11 = vpop.eup %2415 }
 0x4e2   : > { %v1312_v12 = vsel %vm924_vm3, %v2416_v11, 0.0 }
 0x4e3   : > { %1313 = vadd.xlane.f32.xlu0 %v1312_v12 }
 0x4eb   : > { %v979_v13 = vpop.xlane.xlu1 %978 }
 0x4ec   : > { %2417 = vrcp.f32 %v979_v13  ;;  %1208 = vrot.lane.b32.xlu1 %v3638_v24, %s3027_s24  ;;  %v2399_v13 = vld [vmem:[#allocation20] sm:$0xff]   ;;  %s2883_s24 = scalar_lea.vmem %s3721_s8, 128 }
 0x4ed   : > { %p2884_p5 = scmp.ne.s32.totalorder %s3721_s8, %s2883_s24 }
 0x4ef   : > { %v987_v14 = vpop.permute.xlu1 %986  ;;  %p2885_p3 = pnand %p2884_p5, %p3867_p8 }
 0x4f0   : > { %v993_v15 = vsel %vm991_vm4, %v987_v14, 0  ;;  %1318 = vrot.lane.b32.xlu1 %v3638_v24, %s3028_s0  ;;  %v2400_v14 = vld [vmem:[#allocation20 + $0x8] sm:$0xff]   ;;  %s2887_s0 = sshll.u32 %s3033_s2, 4  ;;  %s2888_s0 = int_to_ptr.vmem [resolvable:$false] %s2887_s0 }
 0x4f1   : > { %2093 = vmatpush3.bf16.msra.mxu1 %v993_v15  ;;  %v2401_v15 = vld [vmem:[#allocation23] sm:$0xff]   ;;  %p2886_p12 = pneg %p2885_p3  ;;  %p2890_p6 = scmp.lt.s32.totalorder %s3721_s8, %s2888_s0 }
 0x4f2   : > { %2104 = vmatprep.subr.bf16.mxu1 %v3021_v0 }
 0x4f6   : > { %v2418_v16 = vpop.eup %2417 }
 0x4f7   : > { %v981_v17 = vmul.f32 %v2418_v16, %v2410_v58 }
 0x4f9   : > { %1098 = vrot.lane.b32.xlu0 %v3638_v24, %s3029_s21  ;;  %v982_v18 = vpack.c.bf16 %v981_v17, %v981_v17  ;;  %s2889_s21 = scalar_lea.vmem %s2888_s0, 256 }
 0x4fa   : > { %p2891_p13 = scmp.lt.s32.totalorder %s2889_s21, %s2883_s24 }
 0x4fb   : > { %2095 = vmatmul.mubr.msk.bf16.vlgmr.msra.gmra.mrb[12].mxu1 %vm924_vm3, %v982_v18 }
 0x4fc   : > { %2106 = vmatprep.mubr.msk.bf16.mxu1 %vm3022_vm0, %v3021_v0  ;;  %p2892_p4 = por %p2891_p13, %p2890_p6 }
 0x4fe   : > { %p2893_p9 = pnand %p2892_p4, %p2886_p12 }
 0x560   : > { %v1094_v19 = vpop.xlane.xlu0 %1093 }
 0x561   : > { %2419 = vrcp.f32 %v1094_v19  ;;  %v2012_v19 = vld [vmem:[#allocation17] ss:$0 sm:$0xff] }
 0x568   : > { %v1204_v20 = vpop.xlane.xlu1 %1203 }
 0x569   : > { %2421 = vrcp.f32 %v1204_v20 }
 0x56b   : > { %v2420_v21 = vpop.eup %2419 }
 0x56c   : > { %v1096_v23 = vmul.f32 %v2420_v21, %v2412_v3  ;;  %v1209_v27 = vpop.permute.xlu1 %1208  ;;  %v2013_v21 = vld [vmem:[#allocation18] ss:$0 sm:$0xff] }
 0x56d   : > { %v1214_v29 = vsel %vm991_vm4, %v1209_v27, 0  ;;  %v2403_v27 = vld [vmem:[#allocation23 + $0x10] sm:$0xff]  }
 0x56e   : > { %v1097_v24 = vpack.c.bf16 %v1096_v23, %v1096_v23 }
 0x570   : > { %v1314_v22 = vpop.xlane.xlu0 %1313  ;;  %v1319_v31 = vpop.permute.xlu1 %1318 }
 0x571   : > { %2423 = vrcp.f32 %v1314_v22  ;;  %v1324_v34 = vsel %vm991_vm4, %v1319_v31, 0  ;;  %v2408_v31 = vld [vmem:[#allocation23 + $0x38] sm:$0xff]  }
 0x573   : > { %v2422_v28 = vpop.eup %2421 }
 0x574   : > { %v1099_v25 = vpop.permute.xlu0 %1098  ;;  %v1206_v30 = vmul.f32 %v2422_v28, %v2414_v9  ;;  %v2405_v28 = vld [vmem:[#allocation23 + $0x20] sm:$0xff]  }
 0x575   : > { %v1104_v26 = vsel %vm991_vm4, %v1099_v25, 0 }
 0x576   : > { %2105 = vmatpush3.bf16.msra.mxu1 %v1104_v26  ;;  %v1207_v32 = vpack.c.bf16 %v1206_v30, %v1206_v30  ;;  %v2402_v26 = vld [vmem:[#allocation23 + $0x8] sm:$0xff]   ;;  %v2407_v30 = vld [vmem:[#allocation23 + $0x30] sm:$0xff]  }
 0x577   : > { %2116 = vmatprep.subr.bf16.mxu1 %v3021_v0 }
 0x579   : > { %2107 = vmatmul.mubr.msk.bf16.vlgmr.msra.gmra.mrb[16].mxu1 %vm924_vm3, %v1097_v24  ;;  %v2404_v24 = vld [vmem:[#allocation23 + $0x18] sm:$0xff]  }
 0x57a   : > { %2117 = vmatpush3.bf16.msra.mxu1 %v1214_v29  ;;  %2118 = vmatprep.mubr.msk.bf16.mxu1 %vm3022_vm0, %v3021_v0  ;;  %v2406_v29 = vld [vmem:[#allocation23 + $0x28] sm:$0xff]  }
 0x57b   : > { %2128 = vmatprep.subr.bf16.mxu1 %v3021_v0  ;;  %v2424_v33 = vpop.eup %2423 }
 0x57c   : > { %v1316_v35 = vmul.f32 %v2424_v33, %v2416_v11 }
 0x57e   : > { %v1317_v36 = vpack.c.bf16 %v1316_v35, %v1316_v35 }
 0x581   : > { %2119 = vmatmul.mubr.msk.bf16.vlgmr.msra.gmra.mrb[20].mxu1 %vm924_vm3, %v1207_v32  ;;  %v2014_v32 = vld [vmem:[#allocation21] ss:$0 sm:$0xff] }
 0x582   : > { %2129 = vmatpush3.bf16.msra.mxu1 %v1324_v34  ;;  %2130 = vmatprep.mubr.msk.bf16.mxu1 %vm3022_vm0, %v3021_v0 }
 0x583   : > { %2142 = vmatprep.subr.bf16.mxu1 %v3021_v0 }
 0x589   : > { %2131 = vmatmul.mubr.msk.bf16.vlgmr.msra.gmra.mrb[24].mxu1 %vm924_vm3, %v1317_v36 }
 0x58a   : > { %2146 = vmatprep.mubr.msk.bf16.mxu1 %vm3022_vm0, %v3021_v0  ;;  %2143 = vmatpush3.bf16.msra.mxu1 %v2399_v13 }
 0x58b   : > { %2144 = vmatprep.subr.bf16.mxu1 %v3021_v0 }
 0x58e   : > { %2145 = vmatpush3.bf16.msra.mxu1 %v2400_v14 }
 0x5ce   : > { %v1029_v37 = vpop.f32.mrb[12].mxu1 }
 0x5cf   : > { %v2096_v38 = vpop.f32.mrb[13].mxu1 }
 0x5d0   : > { %v1032_v39 = vpop.f32.mrb[14].mxu1 }
 0x5d1   : > { %v2097_v40 = vpop.f32.mrb[15].mxu1 }
 0x64c   : > { %v1140_v42 = vpop.f32.mrb[16].mxu1 }
 0x64d   : > { %1367 = vrot.lane.b32.xlu0 %v1140_v42, %s3030_s5  ;;  %v2108_v43 = vpop.f32.mrb[17].mxu1 }
 0x64e   : > { %v1143_v44 = vpop.f32.mrb[18].mxu1 }
 0x64f   : > { %v2109_v45 = vpop.f32.mrb[19].mxu1 }
 0x654   : > { %v1250_v47 = vpop.f32.mrb[20].mxu1 }
 0x655   : > { %1371 = vrot.lane.b32.xlu1 %v1250_v47, %s3031_s6  ;;  %v2120_v48 = vpop.f32.mrb[21].mxu1 }
 0x656   : > { %v1253_v49 = vpop.f32.mrb[22].mxu1 }
 0x657   : > { %v2121_v50 = vpop.f32.mrb[23].mxu1 }
 0x65c   : > { %v1360_v51 = vpop.f32.mrb[24].mxu1 }
 0x65d   : > { %1375 = vrot.lane.b32.xlu0 %v1360_v51, %s3032_s18  ;;  %v2132_v52 = vpop.f32.mrb[25].mxu1 }
 0x65e   : > { %v1363_v53 = vpop.f32.mrb[26].mxu1 }
 0x65f   : > { %v2133_v54 = vpop.f32.mrb[27].mxu1 }
 0x6bf   : > { %v1368_v55 = vpop.permute.xlu0 %1367 }
 0x6c0   : > { %v1378_v57 = vsel %vm924_vm3, %v1029_v37, %v1368_v55 }
 0x6c7   : > { %v1372_v56 = vpop.permute.xlu1 %1371 }
 0x6c8   : > { %v1380_v58 = vsel %vm1379_vm5, %v1378_v57, %v1372_v56 }
 0x6cf   : > { %v1376_v59 = vpop.permute.xlu0 %1375 }
 0x6d0   : > { %v1382_v60 = vsel %vm1381_vm6, %v1380_v58, %v1376_v59 }
 0x6d1   : > { %v1383_v61 = vpack.c.bf16 %v1382_v60, %v1382_v60 }
 0x6d3   : > { %2139 = vmatmul.mubr.msk.bf16.vlgmr.msra.gmra.mrb[12].mxu0 %vm806_vm1, %v1383_v61 }
 0x6d4   : > { %2166 = vmatprep.mubr.msk.bf16.mxu0 %vm3022_vm0, %v3021_v0  ;;  %2151 = vmatpush3.bf16.msra.mxu0 %v2401_v15 }
 0x6d5   : > { %2152 = vmatprep.subr.bf16.mxu0 %v3021_v0 }
 0x6d8   : > { %2153 = vmatpush3.bf16.msra.mxu0 %v2402_v26 }
 0x6d9   : > { %2154 = vmatprep.subr.bf16.mxu0 %v3021_v0 }
 0x6dc   : > { %2155 = vmatpush3.bf16.msra.mxu0 %v2403_v27 }
 0x6dd   : > { %2156 = vmatprep.subr.bf16.mxu0 %v3021_v0 }
 0x6e0   : > { %2157 = vmatpush3.bf16.msra.mxu0 %v2404_v24 }
 0x6e1   : > { %2158 = vmatprep.subr.bf16.mxu0 %v3021_v0 }
 0x6e4   : > { %2159 = vmatpush3.bf16.msra.mxu0 %v2405_v28 }
 0x6e5   : > { %2160 = vmatprep.subr.bf16.mxu0 %v3021_v0 }
 0x6e8   : > { %2161 = vmatpush3.bf16.msra.mxu0 %v2406_v29 }
 0x6e9   : > { %2162 = vmatprep.subr.bf16.mxu0 %v3021_v0 }
 0x6ec   : > { %2163 = vmatpush3.bf16.msra.mxu0 %v2407_v30 }
 0x6ed   : > { %2164 = vmatprep.subr.bf16.mxu0 %v3021_v0  ;;  %v2018_v0 = vld [vmem:[#allocation24] ss:$0 sm:$0xff] }
 0x6f0   : > { %2165 = vmatpush3.bf16.msra.mxu0 %v2408_v31 }
 0x7a6   : > { %v1444_v63 = vpop.f32.mrb[12].mxu0 }
 0x7a7   : > { %v1445_v1 = vadd.f32 %v2008_v62, %v1444_v63  ;;  %v2140_v2 = vpop.f32.mrb[13].mxu0 }
 0x7a8   : > { %v1447_v3 = vpop.f32.mrb[14].mxu0 }
 0x7a9   : > { %v2141_v4 = vpop.f32.mrb[15].mxu0  ;;  %v1450_v5 = vadd.f32 %v1445_v1, %v3625_v7  ;;  %v2027_v1 = vld [vmem:[#allocation26] ss:$0 sm:$0xff]  ;;  %v2028_v3 = vld [vmem:[#allocation27] ss:$0 sm:$0xff] }
 0x7ab   : > { %v1453_v6 = vsel %vm806_vm1, %v1450_v5, 0.0 }
 0x7ac   : > { %1454 = vadd.xlane.f32.xlu1 %v1453_v6 }
 0x839   : > { %v1455_v8 = vpop.xlane.xlu1 %1454 }
 0x83a   : > { %v1457_v9 = vmul.f32 0.03125, %v1455_v8 }
 0x83c   : > { %v1458_v10 = vsub.f32 %v1450_v5, %v1457_v9 }
 0x83e   : > { %v1459_v11 = vmul.f32 %v1458_v10, %v1458_v10 }
 0x840   : > { %v1460_v12 = vsel %vm806_vm1, %v1459_v11, 0.0 }
 0x841   : > { %1461 = vadd.xlane.f32.xlu0 %v1460_v12 }
 0x8ce   : > { %v1462_v7 = vpop.xlane.xlu0 %1461 }
 0x8cf   : > { %v1463_v16 = vmul.f32 0.03125, %v1462_v7 }
 0x8d1   : > { %v1464_v17 = vadd.f32 1e-05, %v1463_v16 }
 0x8d3   : > { %2425 = vrsqrt.f32 %v1464_v17 }
 0x8dd   : > { %v2426_v18 = vpop.eup %2425 }
 0x8de   : > { %v1466_v20 = vmul.f32 %v2426_v18, %v1458_v10 }
 0x8e0   : > { %v1473_v22 = vmul.f32 %v2012_v19, %v1466_v20 }
 0x8e2   : > { %v1480_v23 = vadd.f32 %v2013_v21, %v1473_v22 }
 0x8e4   : > { %v1481_v25 = vpack.c.bf16 %v1480_v23, %v1480_v23 }
 0x8e6   : > { %2147 = vmatmul.mubr.msk.bf16.vlgmr.msra.gmra.mrb[28].mxu1 %vm806_vm1, %v1481_v25 }
 0x9b9   : > { %v1542_v33 = vpop.f32.mrb[28].mxu1 }
 0x9ba   : > { %v1543_v34 = vadd.f32 %v2014_v32, %v1542_v33  ;;  %v2148_v35 = vpop.f32.mrb[29].mxu1 }
 0x9bb   : > { %v1545_v36 = vpop.f32.mrb[30].mxu1 }
 0x9bc   : > { %v1549_v37 = vmul.f32 0.044715, %v1543_v34  ;;  %v2149_v38 = vpop.f32.mrb[31].mxu1  ;;  %v1548_v44 = vmul.f32 0.5, %v1543_v34 }
 0x9be   : > { %v1550_v39 = vmul.f32 %v1549_v37, %v1543_v34 }
 0x9c0   : > { %v1551_v40 = vmul.f32 %v1550_v39, %v1543_v34 }
 0x9c2   : > { %v1552_v41 = vadd.f32 %v1551_v40, %v1543_v34 }
 0x9c4   : > { %v1553_v42 = vmul.f32 0.7978846, %v1552_v41 }
 0x9c6   : > { %2427 = vtanh.f32 %v1553_v42 }
 0x9d0   : > { %v2428_v43 = vpop.eup %2427 }
 0x9d1   : > { %v1555_v45 = vadd.f32 1.0, %v2428_v43 }
 0x9d3   : > { %v1556_v46 = vmul.f32 %v1555_v45, %v1548_v44 }
 0x9d5   : > { %v1557_v47 = vpack.c.bf16 %v1556_v46, %v1556_v46 }
 0x9d7   : > { %2167 = vmatmul.mubr.bf16.vlgmr.msra.gmra.mrb[16].mxu0 %v1557_v47 }
 0xaaa   : > { %v1663_v48 = vpop.f32.mrb[16].mxu0 }
 0xaab   : > { %v1664_v49 = vadd.f32 %v2018_v0, %v1663_v48  ;;  %v2168_v50 = vpop.f32.mrb[17].mxu0 }
 0xaac   : > { %v1666_v51 = vpop.f32.mrb[18].mxu0 }
 0xaad   : > { %v2169_v52 = vpop.f32.mrb[19].mxu0  ;;  %v1669_v53 = vadd.f32 %v1664_v49, %v1480_v23 }
 0xaaf   : > { %v1672_v54 = vsel %vm806_vm1, %v1669_v53, 0.0 }
 0xab0   : > { %1673 = vadd.xlane.f32.xlu0 %v1672_v54 }
 0xb3d   : > { %v1674_v55 = vpop.xlane.xlu0 %1673 }
 0xb3e   : > { %v1675_v56 = vmul.f32 0.03125, %v1674_v55 }
 0xb40   : > { %v1676_v57 = vsub.f32 %v1669_v53, %v1675_v56 }
 0xb42   : > { %v1677_v58 = vmul.f32 %v1676_v57, %v1676_v57 }
 0xb44   : > { %v1678_v59 = vsel %vm806_vm1, %v1677_v58, 0.0 }
 0xb45   : > { %1679 = vadd.xlane.f32.xlu1 %v1678_v59 }
 0xbd2   : > { %v1680_v60 = vpop.xlane.xlu1 %1679 }
 0xbd3   : > { %v1681_v61 = vmul.f32 0.03125, %v1680_v60 }
 0xbd5   : > { %v1682_v62 = vadd.f32 1e-05, %v1681_v61 }
 0xbd7   : > { %2429 = vrsqrt.f32 %v1682_v62 }
 0xbe1   : > { %v2430_v63 = vpop.eup %2429 }
 0xbe2   : > { %v1684_v2 = vmul.f32 %v2430_v63, %v1676_v57 }
 0xbe4   : > { %v1691_v4 = vmul.f32 %v2027_v1, %v1684_v2 }
 0xbe6   : > { %v1698_v5 = vadd.f32 %v2028_v3, %v1691_v4 }
 0xbe8   : > { %1699 = vst.msk [vmem:[%s775_s27] sm:$0xff] %vm806_vm1, %v1698_v5 }
 0xbe9   : > { %2896 = shalt.err (!%p2893_p9)
}
 0xbea   : > { %s2897_s16 = scalar_lea.hbm %s3719_s7, 128  ;;  %s2901_s18 = scalar_lea.hbm %s3866_s29, 256 }
 0xbeb   : > { %p2898_p0 = scmp.ne.s32.totalorder %s3719_s7, %s2897_s16  ;;  %p2902_p2 = scmp.lt.u32.totalorder %s3719_s7, %s3866_s29 }
 0xbec   : > { %p2903_p10 = scmp.lt.u32.totalorder %s2901_s18, %s2897_s16  ;;  %p2905_p5 = scmp.lt.u32.totalorder %s2897_s16, %s3719_s7 }
 0xbed   : > { %p2899_p7 = pnand %p2898_p0, %p3867_p8 }
 0xbee   : > { %p2904_p1 = por %p2903_p10, %p2902_p2 }
 0xbef   : > { %p2900_p11 = pneg %p2899_p7 }
 0xbf0   : > { %p2906_p3 = por %p2905_p5, %p2904_p1 }
 0xbf2   : > { %p2907_p12 = pnand %p2906_p3, %p2900_p11 }
 0xbf4   : > { %2910 = shalt.err (!%p2907_p12)
}
 0xbf5   : > { %2230 = dma.vmem_to_hbm [thread:$0]  (%p3867_p8), %s3721_s8, 128, %s3719_s7, %s1701_s3  }
 0xbf6 PF: > { %s3868_s27 = sld [smem:[#allocation41_spill]]  ;;  %p3869_p6 = scmp.ne.s32.totalorder %s3839_s23, 0 }
 0xbf7   : > { %p3870_p13 = scmp.ge.s32.totalorder %s3001_s26, 2 }
 0xbf9   : > { %p2283_p4 = pnand %p3870_p13, %p3869_p6 }
 0xbfc   : > { %s1727_s20 = sand.u32 1, %s3868_s27  }
 0xbfd   : > { %s1728_s25 = scalar_lea.sflag [#allocation5], %s1727_s20 }
 0xbfe   : > { %2976 = dma.done.wait (!%p2283_p4), %s1728_s25, 128  }
 0xbff   : > { %2978 = vsyncadd (!%p2283_p4), %s1728_s25, 4294967168  ;;  %s42_s26 = sadd.s32 1, %s3001_s26   ;;  %s3871_s21 = sld [smem:[#allocation42_spill]] }
 0xc00   : > { %p39_p9 = scmp.ge.s32.totalorder %s42_s26, 4   ;;  %s3872_s22 = sld [smem:[#allocation43_spill]] }
 0xc01   : > { %s3873_s24 = sld [smem:[#allocation45_spill]]  ;;  %s3874_s23 = smov %s3487_s30 }
 0xc02   : > { %s3875_s25 = smov %s3877_s17  ;;  %41 = sbr.rel (!%p39_p9) target bundleno = 26 (0x1a), region = 202 }
 0xc09   :  { %1733 = vsyncpa [#allocation4], 1 }
 0xc0a   :  { %1735 = vsyncpa [#allocation4 + $0x1], 1 }
 0xc0b   :  { %1736 = vsyncpa [#allocation7], 1 }
 0xc0c   :  { %1738 = vsyncpa [#allocation7 + $0x1], 1 }
 0xc0d   :  { %1739 = vsyncpa [#allocation10], 1 }
 0xc0e   :  { %1740 = vsyncpa [#allocation13], 1 }
 0xc0f   :  { %1741 = vsyncpa [#allocation16], 1 }
 0xc10   :  { %1742 = vsyncpa [#allocation19], 1 }
 0xc11   :  { %1743 = vsyncpa [#allocation22], 1 }
 0xc12   :  { %1744 = vsyncpa [#allocation25], 1 }
 0xc13   :  { %1745 = vsyncpa [#allocation28], 1 }
 0xc14   :  { %1746 = vsyncpa [#allocation5], 1 }
 0xc15   :  { %1748 = vsyncpa [#allocation5 + $0x1], 1 }

</bundles_post_ra>
